<compile_context>
chip_gen: v5e
topology: v5e:2x2
jax: 0.10.0
libtpu: 0.0.40
codegen_flags: <defaults>
</compile_context>

<pallas_src>
import numpy as np
import jax
import jax.numpy as jnp
from jax import lax
from jax.experimental import pallas as pl
from jax.experimental.pallas import tpu as pltpu


# ----------------------------------------------------------------------------
# Host-side one-time weight repacking (reflect pad / stride folded into mats).
# ----------------------------------------------------------------------------
def _reflect(idx, n):
    if idx < 0:
        return -idx
    if idx >= n:
        return 2 * (n - 1) - idx
    return idx


def _round_up(x, m):
    return ((x + m - 1) // m) * m


def prepare_packed_params(params, B, H, W):
    """Pack all conv layers into 3 dense operand arrays + epilogue matrices.

    Layout inside the kernel:
      activations : (R, LANE)  with R = B*H rows (batch*height on sublanes)
                    and LANE = 128-padded width*channels on lanes.
      G_all : (n_taps, R, R)       0/1 row-select (reflect pad + H-stride),
                                   block-diagonal over the batch.
      W_all : (n_taps, LANE, LANE) Toeplitz weights (reflect pad + W-stride).
      b_all : (n_layers, LANE)     bias tiled over output width positions.
      Mf    : (LANE, LANE)         avg-pool(1/HW) + final 1x1 conv.
      bf    : (1, LANE)            final bias (lane padded).
      S     : (out_rows, R)        per-sample row-sum selector for the pool.
    """
    conv_ps = params[:-1]
    geoms = []  # (kh, kw, cin, cout, stride, pad, h_in, w_in, h_out, w_out)
    h, w = H, W
    for p in conv_ps:
        kh, kw, cin, cout = np.asarray(p["w"]).shape
        s, pad = p["stride"], p["pad"]
        ho = (h + 2 * pad - kh) // s + 1
        wo = (w + 2 * pad - kw) // s + 1
        geoms.append((kh, kw, cin, cout, s, pad, h, w, ho, wo))
        h, w = ho, wo

    R = B * H
    lane_needs = [geoms[0][7] * geoms[0][2]] + [g[9] * g[3] for g in geoms] + [128]
    LANE = _round_up(max(lane_needs), 128)

    khs = tuple(g[0] for g in geoms)
    n_taps = sum(khs)
    G_all = np.zeros((n_taps, R, R), np.float32)
    W_all = np.zeros((n_taps, LANE, LANE), np.float32)
    b_all = np.zeros((len(conv_ps), LANE), np.float32)

    off = 0
    for li, (p, g) in enumerate(zip(conv_ps, geoms)):
        kh, kw, cin, cout, s, pad, hi, wi_, ho, wo = g
        wt = np.asarray(p["w"], np.float32)   # HWIO: (KH, KW, Cin, Cout)
        b = np.asarray(p["b"], np.float32)
        for i in range(kh):
            # Row selection (reflect pad + stride along H), block-diag over batch.
            for bb in range(B):
                for r in range(ho):
                    src = _reflect(r * s + i - pad, hi)
                    G_all[off + i, bb * ho + r, bb * hi + src] += 1.0
            # Toeplitz weights (reflect pad + stride along W); += because two
            # kernel taps can reflect onto the same source column.
            for c in range(wo):
                for j in range(kw):
                    wcol = _reflect(c * s + j - pad, wi_)
                    W_all[off + i,
                          wcol * cin:(wcol + 1) * cin,
                          c * cout:(c + 1) * cout] += wt[i, j]
        b_all[li, :wo * cout] = np.tile(b, wo)
        off += kh

    # AdaptiveAvgPool2d(1) + final 1x1 conv folded into one matmul + a
    # per-sample row-sum selection matrix.
    h3, w3 = geoms[-1][8], geoms[-1][9]
    wf = np.asarray(params[-1]["w"], np.float32)   # (1, 1, C3, style_dim)
    bf = np.asarray(params[-1]["b"], np.float32)
    c3, sd = wf.shape[2], wf.shape[3]
    wf2 = wf.reshape(c3, sd) / float(h3 * w3)
    Mf = np.zeros((LANE, LANE), np.float32)
    for wc in range(w3):
        Mf[wc * c3:(wc + 1) * c3, :sd] = wf2
    bf_pad = np.zeros((1, LANE), np.float32)
    bf_pad[0, :sd] = bf

    out_rows = max(8, _round_up(B, 8))
    S = np.zeros((out_rows, R), np.float32)
    for bb in range(B):
        S[bb, bb * h3:(bb + 1) * h3] = 1.0

    packed = dict(
        G=jnp.asarray(G_all), W=jnp.asarray(W_all), b=jnp.asarray(b_all),
        Mf=jnp.asarray(Mf), bf=jnp.asarray(bf_pad), S=jnp.asarray(S),
    )
    return packed, khs, sd, LANE, out_rows


# ----------------------------------------------------------------------------
# Fused Pallas kernel: whole StyleEncoder forward, full batch, one program.
# ----------------------------------------------------------------------------
def _make_style_encoder_kernel(khs):
    def kernel(x_ref, g_ref, w_ref, b_ref, mf_ref, bf_ref, s_ref, o_ref):
        a = x_ref[...]                                     # (R, LANE)
        off = 0
        for l, kh in enumerate(khs):                       # unrolled: 7 / 4 / 4 taps
            acc = None
            for i in range(kh):
                rows = jnp.dot(g_ref[off + i], a,
                               preferred_element_type=jnp.float32)   # row select
                tap = jnp.dot(rows, w_ref[off + i],
                              preferred_element_type=jnp.float32)    # Toeplitz conv
                acc = tap if acc is None else acc + tap
            a = jnp.maximum(acc + b_ref[pl.ds(l, 1), :], 0.0)  # bias+ReLU (norm='none')
            off += kh
        # Global average pool + final 1x1 conv (Mf already holds Wf / (H*W)),
        # per-sample row sum done by the S selector matmul.
        t = jnp.dot(a, mf_ref[...], preferred_element_type=jnp.float32)
        o_ref[...] = (jnp.dot(s_ref[...], t, preferred_element_type=jnp.float32)
                      + bf_ref[...])
    return kernel


# ----------------------------------------------------------------------------
# Public forward (NCHW in, NCHW (B, style_dim, 1, 1) out)
# ----------------------------------------------------------------------------
def style_encoder_forward(params, x_nchw):
    B, Cin, H, W = x_nchw.shape
    packed, khs, style_dim, LANE, out_rows = prepare_packed_params(params, B, H, W)

    # NCHW -> (B*H, W*Cin), width*channels packed onto lanes, lane-padded.
    x = jnp.transpose(x_nchw, (0, 2, 3, 1)).astype(jnp.float32).reshape(B * H, W * Cin)
    x = jnp.pad(x, ((0, 0), (0, LANE - W * Cin)))

    operands = [x, packed["G"], packed["W"], packed["b"],
                packed["Mf"], packed["bf"], packed["S"]]
    in_specs = [pl.BlockSpec(op.shape, lambda i, _n=op.ndim: (0,) * _n)
                for op in operands]

    out = pl.pallas_call(
        _make_style_encoder_kernel(khs),
        out_shape=jax.ShapeDtypeStruct((out_rows, LANE), jnp.float32),
        grid=(1,),
        in_specs=in_specs,
        out_specs=pl.BlockSpec((out_rows, LANE), lambda i: (0, 0)),
        compiler_params=pltpu.CompilerParams(dimension_semantics=("arbitrary",)),
    )(*operands)

    return out[:B, :style_dim].reshape(B, style_dim, 1, 1)


# ----------------------------------------------------------------------------
# Parameters (synthetic, HWIO) + pure-JAX reference for correctness checking.
# ----------------------------------------------------------------------------
def init_style_encoder_params(key, n_downsample, input_dim, dim, style_dim):
    specs = []
    d = dim
    specs.append((7, 1, 3, input_dim, d))
    for _ in range(2):
        specs.append((4, 2, 1, d, 2 * d))
        d *= 2
    for _ in range(n_downsample - 2):
        specs.append((4, 2, 1, d, d))
    specs.append((1, 1, 0, d, style_dim))  # final 1x1 conv

    keys = jax.random.split(key, len(specs))
    params = []
    for k, (ks, s, p, cin, cout) in zip(keys, specs):
        k1, k2 = jax.random.split(k)
        fan_in = ks * ks * cin
        w = jax.random.normal(k1, (ks, ks, cin, cout), jnp.float32) / np.sqrt(fan_in)
        b = 0.01 * jax.random.normal(k2, (cout,), jnp.float32)
        params.append({"w": w, "b": b, "stride": s, "pad": p})
    return params


def reference_forward(params, x_nchw, pad_type="reflect"):
    x = jnp.transpose(x_nchw, (0, 2, 3, 1)).astype(jnp.float32)
    for p in params[:-1]:
        pad = p["pad"]
        if pad > 0:
            mode = "reflect" if pad_type == "reflect" else "constant"
            xp = jnp.pad(x, ((0, 0), (pad, pad), (pad, pad), (0, 0)), mode=mode)
        else:
            xp = x
        y = lax.conv_general_dilated(
            xp, p["w"], (p["stride"], p["stride"]), "VALID",
            dimension_numbers=("NHWC", "HWIO", "NHWC"),
        )
        x = jnp.maximum(y + p["b"], 0.0)
    pooled = jnp.mean(x, axis=(1, 2))
    final = params[-1]
    style = pooled @ final["w"].reshape(x.shape[-1], -1) + final["b"]
    return style.reshape(x.shape[0], -1, 1, 1)


# TODO(synk): norm='adain'/'ln'/'bn' and the SpectralNorm branch of Conv2dBlock
# are not exercised by this configuration (norm='none') and are not implemented.

if __name__ == "__main__":
    key = jax.random.PRNGKey(0)
    kx, kp = jax.random.split(key)

    B, Cin, H, W = 2, 4, 16, 16
    n_downsample, dim, style_dim = 2, 8, 8

    x = jax.random.normal(kx, (B, Cin, H, W), jnp.float32)
    params = init_style_encoder_params(kp, n_downsample, Cin, dim, style_dim)

    out = style_encoder_forward(params, x)
    out = jax.block_until_ready(out)

    assert out.shape == (B, style_dim, 1, 1), out.shape
    ref = reference_forward(params, x)
    np.testing.assert_allclose(np.asarray(out), np.asarray(ref), rtol=1e-3, atol=1e-3)

    print("KERNEL_OK")
</pallas_src>

<mosaic_0001>
module attributes {stable_mosaic.version = 11 : i64} {
  func.func @kernel(%arg0: i32, %arg1: memref<32x128xf32, #tpu.memory_space<vmem>>, %arg2: memref<15x32x32xf32, #tpu.memory_space<vmem>>, %arg3: memref<15x128x128xf32, #tpu.memory_space<vmem>>, %arg4: memref<3x128xf32, #tpu.memory_space<vmem>>, %arg5: memref<128x128xf32, #tpu.memory_space<vmem>>, %arg6: memref<1x128xf32, #tpu.memory_space<vmem>>, %arg7: memref<8x32xf32, #tpu.memory_space<vmem>>, %arg8: memref<8x128xf32, #tpu.memory_space<vmem>>) attributes {dimension_semantics = [#tpu.dimension_semantics<arbitrary>], iteration_bounds = array<i64: 1>, scalar_prefetch = 0 : i64, scratch_operands = 0 : i64, tpu.core_type = #tpu.core_type<tc>, window_params = [{pipeline_mode = #tpu.pipeline_mode<synchronous>, transform_indices = @transform_0, window_bounds = array<i64: 32, 128>}, {pipeline_mode = #tpu.pipeline_mode<synchronous>, transform_indices = @transform_1, window_bounds = array<i64: 15, 32, 32>}, {pipeline_mode = #tpu.pipeline_mode<synchronous>, transform_indices = @transform_2, window_bounds = array<i64: 15, 128, 128>}, {pipeline_mode = #tpu.pipeline_mode<synchronous>, transform_indices = @transform_3, window_bounds = array<i64: 3, 128>}, {pipeline_mode = #tpu.pipeline_mode<synchronous>, transform_indices = @transform_4, window_bounds = array<i64: 128, 128>}, {pipeline_mode = #tpu.pipeline_mode<synchronous>, transform_indices = @transform_5, window_bounds = array<i64: 1, 128>}, {pipeline_mode = #tpu.pipeline_mode<synchronous>, transform_indices = @transform_6, window_bounds = array<i64: 8, 32>}, {pipeline_mode = #tpu.pipeline_mode<synchronous>, transform_indices = @transform_7, window_bounds = array<i64: 8, 128>}]} {
    %c0 = arith.constant 0 : index
    %c0_0 = arith.constant 0 : index
    %0 = vector.load %arg1[%c0, %c0_0] : memref<32x128xf32, #tpu.memory_space<vmem>>, vector<32x128xf32>
    %c0_1 = arith.constant 0 : index
    %c0_2 = arith.constant 0 : index
    %c0_3 = arith.constant 0 : index
    %1 = vector.load %arg2[%c0_1, %c0_2, %c0_3] : memref<15x32x32xf32, #tpu.memory_space<vmem>>, vector<1x32x32xf32>
    %2 = vector.shape_cast %1 : vector<1x32x32xf32> to vector<32x32xf32>
    %cst = arith.constant dense<0.000000e+00> : vector<32x128xf32>
    %3 = tpu.matmul %2, %0, %cst {dimension_numbers = #tpu.dot_dimension_numbers<[1], [0], [0], [1], [0, 0, 1, 1], [], []>} : vector<32x32xf32>, vector<32x128xf32>, vector<32x128xf32> -> vector<32x128xf32>
    %c0_4 = arith.constant 0 : index
    %c0_5 = arith.constant 0 : index
    %c0_6 = arith.constant 0 : index
    %4 = vector.load %arg3[%c0_4, %c0_5, %c0_6] : memref<15x128x128xf32, #tpu.memory_space<vmem>>, vector<1x128x128xf32>
    %5 = vector.shape_cast %4 : vector<1x128x128xf32> to vector<128x128xf32>
    %cst_7 = arith.constant dense<0.000000e+00> : vector<32x128xf32>
    %6 = tpu.matmul %3, %5, %cst_7 {dimension_numbers = #tpu.dot_dimension_numbers<[1], [0], [0], [1], [0, 0, 1, 1], [], []>} : vector<32x128xf32>, vector<128x128xf32>, vector<32x128xf32> -> vector<32x128xf32>
    %c1 = arith.constant 1 : index
    %c0_8 = arith.constant 0 : index
    %c0_9 = arith.constant 0 : index
    %7 = vector.load %arg2[%c1, %c0_8, %c0_9] : memref<15x32x32xf32, #tpu.memory_space<vmem>>, vector<1x32x32xf32>
    %8 = vector.shape_cast %7 : vector<1x32x32xf32> to vector<32x32xf32>
    %cst_10 = arith.constant dense<0.000000e+00> : vector<32x128xf32>
    %9 = tpu.matmul %8, %0, %cst_10 {dimension_numbers = #tpu.dot_dimension_numbers<[1], [0], [0], [1], [0, 0, 1, 1], [], []>} : vector<32x32xf32>, vector<32x128xf32>, vector<32x128xf32> -> vector<32x128xf32>
    %c1_11 = arith.constant 1 : index
    %c0_12 = arith.constant 0 : index
    %c0_13 = arith.constant 0 : index
    %10 = vector.load %arg3[%c1_11, %c0_12, %c0_13] : memref<15x128x128xf32, #tpu.memory_space<vmem>>, vector<1x128x128xf32>
    %11 = vector.shape_cast %10 : vector<1x128x128xf32> to vector<128x128xf32>
    %cst_14 = arith.constant dense<0.000000e+00> : vector<32x128xf32>
    %12 = tpu.matmul %9, %11, %cst_14 {dimension_numbers = #tpu.dot_dimension_numbers<[1], [0], [0], [1], [0, 0, 1, 1], [], []>} : vector<32x128xf32>, vector<128x128xf32>, vector<32x128xf32> -> vector<32x128xf32>
    %13 = arith.addf %6, %12 : vector<32x128xf32>
    %c2 = arith.constant 2 : index
    %c0_15 = arith.constant 0 : index
    %c0_16 = arith.constant 0 : index
    %14 = vector.load %arg2[%c2, %c0_15, %c0_16] : memref<15x32x32xf32, #tpu.memory_space<vmem>>, vector<1x32x32xf32>
    %15 = vector.shape_cast %14 : vector<1x32x32xf32> to vector<32x32xf32>
    %cst_17 = arith.constant dense<0.000000e+00> : vector<32x128xf32>
    %16 = tpu.matmul %15, %0, %cst_17 {dimension_numbers = #tpu.dot_dimension_numbers<[1], [0], [0], [1], [0, 0, 1, 1], [], []>} : vector<32x32xf32>, vector<32x128xf32>, vector<32x128xf32> -> vector<32x128xf32>
    %c2_18 = arith.constant 2 : index
    %c0_19 = arith.constant 0 : index
    %c0_20 = arith.constant 0 : index
    %17 = vector.load %arg3[%c2_18, %c0_19, %c0_20] : memref<15x128x128xf32, #tpu.memory_space<vmem>>, vector<1x128x128xf32>
    %18 = vector.shape_cast %17 : vector<1x128x128xf32> to vector<128x128xf32>
    %cst_21 = arith.constant dense<0.000000e+00> : vector<32x128xf32>
    %19 = tpu.matmul %16, %18, %cst_21 {dimension_numbers = #tpu.dot_dimension_numbers<[1], [0], [0], [1], [0, 0, 1, 1], [], []>} : vector<32x128xf32>, vector<128x128xf32>, vector<32x128xf32> -> vector<32x128xf32>
    %20 = arith.addf %13, %19 : vector<32x128xf32>
    %c3 = arith.constant 3 : index
    %c0_22 = arith.constant 0 : index
    %c0_23 = arith.constant 0 : index
    %21 = vector.load %arg2[%c3, %c0_22, %c0_23] : memref<15x32x32xf32, #tpu.memory_space<vmem>>, vector<1x32x32xf32>
    %22 = vector.shape_cast %21 : vector<1x32x32xf32> to vector<32x32xf32>
    %cst_24 = arith.constant dense<0.000000e+00> : vector<32x128xf32>
    %23 = tpu.matmul %22, %0, %cst_24 {dimension_numbers = #tpu.dot_dimension_numbers<[1], [0], [0], [1], [0, 0, 1, 1], [], []>} : vector<32x32xf32>, vector<32x128xf32>, vector<32x128xf32> -> vector<32x128xf32>
    %c3_25 = arith.constant 3 : index
    %c0_26 = arith.constant 0 : index
    %c0_27 = arith.constant 0 : index
    %24 = vector.load %arg3[%c3_25, %c0_26, %c0_27] : memref<15x128x128xf32, #tpu.memory_space<vmem>>, vector<1x128x128xf32>
    %25 = vector.shape_cast %24 : vector<1x128x128xf32> to vector<128x128xf32>
    %cst_28 = arith.constant dense<0.000000e+00> : vector<32x128xf32>
    %26 = tpu.matmul %23, %25, %cst_28 {dimension_numbers = #tpu.dot_dimension_numbers<[1], [0], [0], [1], [0, 0, 1, 1], [], []>} : vector<32x128xf32>, vector<128x128xf32>, vector<32x128xf32> -> vector<32x128xf32>
    %27 = arith.addf %20, %26 : vector<32x128xf32>
    %c4 = arith.constant 4 : index
    %c0_29 = arith.constant 0 : index
    %c0_30 = arith.constant 0 : index
    %28 = vector.load %arg2[%c4, %c0_29, %c0_30] : memref<15x32x32xf32, #tpu.memory_space<vmem>>, vector<1x32x32xf32>
    %29 = vector.shape_cast %28 : vector<1x32x32xf32> to vector<32x32xf32>
    %cst_31 = arith.constant dense<0.000000e+00> : vector<32x128xf32>
    %30 = tpu.matmul %29, %0, %cst_31 {dimension_numbers = #tpu.dot_dimension_numbers<[1], [0], [0], [1], [0, 0, 1, 1], [], []>} : vector<32x32xf32>, vector<32x128xf32>, vector<32x128xf32> -> vector<32x128xf32>
    %c4_32 = arith.constant 4 : index
    %c0_33 = arith.constant 0 : index
    %c0_34 = arith.constant 0 : index
    %31 = vector.load %arg3[%c4_32, %c0_33, %c0_34] : memref<15x128x128xf32, #tpu.memory_space<vmem>>, vector<1x128x128xf32>
    %32 = vector.shape_cast %31 : vector<1x128x128xf32> to vector<128x128xf32>
    %cst_35 = arith.constant dense<0.000000e+00> : vector<32x128xf32>
    %33 = tpu.matmul %30, %32, %cst_35 {dimension_numbers = #tpu.dot_dimension_numbers<[1], [0], [0], [1], [0, 0, 1, 1], [], []>} : vector<32x128xf32>, vector<128x128xf32>, vector<32x128xf32> -> vector<32x128xf32>
    %34 = arith.addf %27, %33 : vector<32x128xf32>
    %c5 = arith.constant 5 : index
    %c0_36 = arith.constant 0 : index
    %c0_37 = arith.constant 0 : index
    %35 = vector.load %arg2[%c5, %c0_36, %c0_37] : memref<15x32x32xf32, #tpu.memory_space<vmem>>, vector<1x32x32xf32>
    %36 = vector.shape_cast %35 : vector<1x32x32xf32> to vector<32x32xf32>
    %cst_38 = arith.constant dense<0.000000e+00> : vector<32x128xf32>
    %37 = tpu.matmul %36, %0, %cst_38 {dimension_numbers = #tpu.dot_dimension_numbers<[1], [0], [0], [1], [0, 0, 1, 1], [], []>} : vector<32x32xf32>, vector<32x128xf32>, vector<32x128xf32> -> vector<32x128xf32>
    %c5_39 = arith.constant 5 : index
    %c0_40 = arith.constant 0 : index
    %c0_41 = arith.constant 0 : index
    %38 = vector.load %arg3[%c5_39, %c0_40, %c0_41] : memref<15x128x128xf32, #tpu.memory_space<vmem>>, vector<1x128x128xf32>
    %39 = vector.shape_cast %38 : vector<1x128x128xf32> to vector<128x128xf32>
    %cst_42 = arith.constant dense<0.000000e+00> : vector<32x128xf32>
    %40 = tpu.matmul %37, %39, %cst_42 {dimension_numbers = #tpu.dot_dimension_numbers<[1], [0], [0], [1], [0, 0, 1, 1], [], []>} : vector<32x128xf32>, vector<128x128xf32>, vector<32x128xf32> -> vector<32x128xf32>
    %41 = arith.addf %34, %40 : vector<32x128xf32>
    %c6 = arith.constant 6 : index
    %c0_43 = arith.constant 0 : index
    %c0_44 = arith.constant 0 : index
    %42 = vector.load %arg2[%c6, %c0_43, %c0_44] : memref<15x32x32xf32, #tpu.memory_space<vmem>>, vector<1x32x32xf32>
    %43 = vector.shape_cast %42 : vector<1x32x32xf32> to vector<32x32xf32>
    %cst_45 = arith.constant dense<0.000000e+00> : vector<32x128xf32>
    %44 = tpu.matmul %43, %0, %cst_45 {dimension_numbers = #tpu.dot_dimension_numbers<[1], [0], [0], [1], [0, 0, 1, 1], [], []>} : vector<32x32xf32>, vector<32x128xf32>, vector<32x128xf32> -> vector<32x128xf32>
    %c6_46 = arith.constant 6 : index
    %c0_47 = arith.constant 0 : index
    %c0_48 = arith.constant 0 : index
    %45 = vector.load %arg3[%c6_46, %c0_47, %c0_48] : memref<15x128x128xf32, #tpu.memory_space<vmem>>, vector<1x128x128xf32>
    %46 = vector.shape_cast %45 : vector<1x128x128xf32> to vector<128x128xf32>
    %cst_49 = arith.constant dense<0.000000e+00> : vector<32x128xf32>
    %47 = tpu.matmul %44, %46, %cst_49 {dimension_numbers = #tpu.dot_dimension_numbers<[1], [0], [0], [1], [0, 0, 1, 1], [], []>} : vector<32x128xf32>, vector<128x128xf32>, vector<32x128xf32> -> vector<32x128xf32>
    %48 = arith.addf %41, %47 : vector<32x128xf32>
    %c0_50 = arith.constant 0 : index
    %c0_51 = arith.constant 0 : index
    %49 = vector.load %arg4[%c0_50, %c0_51] : memref<3x128xf32, #tpu.memory_space<vmem>>, vector<1x128xf32>
    %50 = vector.broadcast %49 : vector<1x128xf32> to vector<32x128xf32>
    %51 = arith.addf %48, %50 : vector<32x128xf32>
    %cst_52 = arith.constant 0.000000e+00 : f32
    %52 = vector.broadcast %cst_52 : f32 to vector<32x128xf32>
    %53 = arith.maximumf %51, %52 : vector<32x128xf32>
    %c7 = arith.constant 7 : index
    %c0_53 = arith.constant 0 : index
    %c0_54 = arith.constant 0 : index
    %54 = vector.load %arg2[%c7, %c0_53, %c0_54] : memref<15x32x32xf32, #tpu.memory_space<vmem>>, vector<1x32x32xf32>
    %55 = vector.shape_cast %54 : vector<1x32x32xf32> to vector<32x32xf32>
    %cst_55 = arith.constant dense<0.000000e+00> : vector<32x128xf32>
    %56 = tpu.matmul %55, %53, %cst_55 {dimension_numbers = #tpu.dot_dimension_numbers<[1], [0], [0], [1], [0, 0, 1, 1], [], []>} : vector<32x32xf32>, vector<32x128xf32>, vector<32x128xf32> -> vector<32x128xf32>
    %c7_56 = arith.constant 7 : index
    %c0_57 = arith.constant 0 : index
    %c0_58 = arith.constant 0 : index
    %57 = vector.load %arg3[%c7_56, %c0_57, %c0_58] : memref<15x128x128xf32, #tpu.memory_space<vmem>>, vector<1x128x128xf32>
    %58 = vector.shape_cast %57 : vector<1x128x128xf32> to vector<128x128xf32>
    %cst_59 = arith.constant dense<0.000000e+00> : vector<32x128xf32>
    %59 = tpu.matmul %56, %58, %cst_59 {dimension_numbers = #tpu.dot_dimension_numbers<[1], [0], [0], [1], [0, 0, 1, 1], [], []>} : vector<32x128xf32>, vector<128x128xf32>, vector<32x128xf32> -> vector<32x128xf32>
    %c8 = arith.constant 8 : index
    %c0_60 = arith.constant 0 : index
    %c0_61 = arith.constant 0 : index
    %60 = vector.load %arg2[%c8, %c0_60, %c0_61] : memref<15x32x32xf32, #tpu.memory_space<vmem>>, vector<1x32x32xf32>
    %61 = vector.shape_cast %60 : vector<1x32x32xf32> to vector<32x32xf32>
    %cst_62 = arith.constant dense<0.000000e+00> : vector<32x128xf32>
    %62 = tpu.matmul %61, %53, %cst_62 {dimension_numbers = #tpu.dot_dimension_numbers<[1], [0], [0], [1], [0, 0, 1, 1], [], []>} : vector<32x32xf32>, vector<32x128xf32>, vector<32x128xf32> -> vector<32x128xf32>
    %c8_63 = arith.constant 8 : index
    %c0_64 = arith.constant 0 : index
    %c0_65 = arith.constant 0 : index
    %63 = vector.load %arg3[%c8_63, %c0_64, %c0_65] : memref<15x128x128xf32, #tpu.memory_space<vmem>>, vector<1x128x128xf32>
    %64 = vector.shape_cast %63 : vector<1x128x128xf32> to vector<128x128xf32>
    %cst_66 = arith.constant dense<0.000000e+00> : vector<32x128xf32>
    %65 = tpu.matmul %62, %64, %cst_66 {dimension_numbers = #tpu.dot_dimension_numbers<[1], [0], [0], [1], [0, 0, 1, 1], [], []>} : vector<32x128xf32>, vector<128x128xf32>, vector<32x128xf32> -> vector<32x128xf32>
    %66 = arith.addf %59, %65 : vector<32x128xf32>
    %c9 = arith.constant 9 : index
    %c0_67 = arith.constant 0 : index
    %c0_68 = arith.constant 0 : index
    %67 = vector.load %arg2[%c9, %c0_67, %c0_68] : memref<15x32x32xf32, #tpu.memory_space<vmem>>, vector<1x32x32xf32>
    %68 = vector.shape_cast %67 : vector<1x32x32xf32> to vector<32x32xf32>
    %cst_69 = arith.constant dense<0.000000e+00> : vector<32x128xf32>
    %69 = tpu.matmul %68, %53, %cst_69 {dimension_numbers = #tpu.dot_dimension_numbers<[1], [0], [0], [1], [0, 0, 1, 1], [], []>} : vector<32x32xf32>, vector<32x128xf32>, vector<32x128xf32> -> vector<32x128xf32>
    %c9_70 = arith.constant 9 : index
    %c0_71 = arith.constant 0 : index
    %c0_72 = arith.constant 0 : index
    %70 = vector.load %arg3[%c9_70, %c0_71, %c0_72] : memref<15x128x128xf32, #tpu.memory_space<vmem>>, vector<1x128x128xf32>
    %71 = vector.shape_cast %70 : vector<1x128x128xf32> to vector<128x128xf32>
    %cst_73 = arith.constant dense<0.000000e+00> : vector<32x128xf32>
    %72 = tpu.matmul %69, %71, %cst_73 {dimension_numbers = #tpu.dot_dimension_numbers<[1], [0], [0], [1], [0, 0, 1, 1], [], []>} : vector<32x128xf32>, vector<128x128xf32>, vector<32x128xf32> -> vector<32x128xf32>
    %73 = arith.addf %66, %72 : vector<32x128xf32>
    %c10 = arith.constant 10 : index
    %c0_74 = arith.constant 0 : index
    %c0_75 = arith.constant 0 : index
    %74 = vector.load %arg2[%c10, %c0_74, %c0_75] : memref<15x32x32xf32, #tpu.memory_space<vmem>>, vector<1x32x32xf32>
    %75 = vector.shape_cast %74 : vector<1x32x32xf32> to vector<32x32xf32>
    %cst_76 = arith.constant dense<0.000000e+00> : vector<32x128xf32>
    %76 = tpu.matmul %75, %53, %cst_76 {dimension_numbers = #tpu.dot_dimension_numbers<[1], [0], [0], [1], [0, 0, 1, 1], [], []>} : vector<32x32xf32>, vector<32x128xf32>, vector<32x128xf32> -> vector<32x128xf32>
    %c10_77 = arith.constant 10 : index
    %c0_78 = arith.constant 0 : index
    %c0_79 = arith.constant 0 : index
    %77 = vector.load %arg3[%c10_77, %c0_78, %c0_79] : memref<15x128x128xf32, #tpu.memory_space<vmem>>, vector<1x128x128xf32>
    %78 = vector.shape_cast %77 : vector<1x128x128xf32> to vector<128x128xf32>
    %cst_80 = arith.constant dense<0.000000e+00> : vector<32x128xf32>
    %79 = tpu.matmul %76, %78, %cst_80 {dimension_numbers = #tpu.dot_dimension_numbers<[1], [0], [0], [1], [0, 0, 1, 1], [], []>} : vector<32x128xf32>, vector<128x128xf32>, vector<32x128xf32> -> vector<32x128xf32>
    %80 = arith.addf %73, %79 : vector<32x128xf32>
    %c1_81 = arith.constant 1 : index
    %c0_82 = arith.constant 0 : index
    %81 = vector.load %arg4[%c1_81, %c0_82] : memref<3x128xf32, #tpu.memory_space<vmem>>, vector<1x128xf32>
    %82 = vector.broadcast %81 : vector<1x128xf32> to vector<32x128xf32>
    %83 = arith.addf %80, %82 : vector<32x128xf32>
    %cst_83 = arith.constant 0.000000e+00 : f32
    %84 = vector.broadcast %cst_83 : f32 to vector<32x128xf32>
    %85 = arith.maximumf %83, %84 : vector<32x128xf32>
    %c11 = arith.constant 11 : index
    %c0_84 = arith.constant 0 : index
    %c0_85 = arith.constant 0 : index
    %86 = vector.load %arg2[%c11, %c0_84, %c0_85] : memref<15x32x32xf32, #tpu.memory_space<vmem>>, vector<1x32x32xf32>
    %87 = vector.shape_cast %86 : vector<1x32x32xf32> to vector<32x32xf32>
    %cst_86 = arith.constant dense<0.000000e+00> : vector<32x128xf32>
    %88 = tpu.matmul %87, %85, %cst_86 {dimension_numbers = #tpu.dot_dimension_numbers<[1], [0], [0], [1], [0, 0, 1, 1], [], []>} : vector<32x32xf32>, vector<32x128xf32>, vector<32x128xf32> -> vector<32x128xf32>
    %c11_87 = arith.constant 11 : index
    %c0_88 = arith.constant 0 : index
    %c0_89 = arith.constant 0 : index
    %89 = vector.load %arg3[%c11_87, %c0_88, %c0_89] : memref<15x128x128xf32, #tpu.memory_space<vmem>>, vector<1x128x128xf32>
    %90 = vector.shape_cast %89 : vector<1x128x128xf32> to vector<128x128xf32>
    %cst_90 = arith.constant dense<0.000000e+00> : vector<32x128xf32>
    %91 = tpu.matmul %88, %90, %cst_90 {dimension_numbers = #tpu.dot_dimension_numbers<[1], [0], [0], [1], [0, 0, 1, 1], [], []>} : vector<32x128xf32>, vector<128x128xf32>, vector<32x128xf32> -> vector<32x128xf32>
    %c12 = arith.constant 12 : index
    %c0_91 = arith.constant 0 : index
    %c0_92 = arith.constant 0 : index
    %92 = vector.load %arg2[%c12, %c0_91, %c0_92] : memref<15x32x32xf32, #tpu.memory_space<vmem>>, vector<1x32x32xf32>
    %93 = vector.shape_cast %92 : vector<1x32x32xf32> to vector<32x32xf32>
    %cst_93 = arith.constant dense<0.000000e+00> : vector<32x128xf32>
    %94 = tpu.matmul %93, %85, %cst_93 {dimension_numbers = #tpu.dot_dimension_numbers<[1], [0], [0], [1], [0, 0, 1, 1], [], []>} : vector<32x32xf32>, vector<32x128xf32>, vector<32x128xf32> -> vector<32x128xf32>
    %c12_94 = arith.constant 12 : index
    %c0_95 = arith.constant 0 : index
    %c0_96 = arith.constant 0 : index
    %95 = vector.load %arg3[%c12_94, %c0_95, %c0_96] : memref<15x128x128xf32, #tpu.memory_space<vmem>>, vector<1x128x128xf32>
    %96 = vector.shape_cast %95 : vector<1x128x128xf32> to vector<128x128xf32>
    %cst_97 = arith.constant dense<0.000000e+00> : vector<32x128xf32>
    %97 = tpu.matmul %94, %96, %cst_97 {dimension_numbers = #tpu.dot_dimension_numbers<[1], [0], [0], [1], [0, 0, 1, 1], [], []>} : vector<32x128xf32>, vector<128x128xf32>, vector<32x128xf32> -> vector<32x128xf32>
    %98 = arith.addf %91, %97 : vector<32x128xf32>
    %c13 = arith.constant 13 : index
    %c0_98 = arith.constant 0 : index
    %c0_99 = arith.constant 0 : index
    %99 = vector.load %arg2[%c13, %c0_98, %c0_99] : memref<15x32x32xf32, #tpu.memory_space<vmem>>, vector<1x32x32xf32>
    %100 = vector.shape_cast %99 : vector<1x32x32xf32> to vector<32x32xf32>
    %cst_100 = arith.constant dense<0.000000e+00> : vector<32x128xf32>
    %101 = tpu.matmul %100, %85, %cst_100 {dimension_numbers = #tpu.dot_dimension_numbers<[1], [0], [0], [1], [0, 0, 1, 1], [], []>} : vector<32x32xf32>, vector<32x128xf32>, vector<32x128xf32> -> vector<32x128xf32>
    %c13_101 = arith.constant 13 : index
    %c0_102 = arith.constant 0 : index
    %c0_103 = arith.constant 0 : index
    %102 = vector.load %arg3[%c13_101, %c0_102, %c0_103] : memref<15x128x128xf32, #tpu.memory_space<vmem>>, vector<1x128x128xf32>
    %103 = vector.shape_cast %102 : vector<1x128x128xf32> to vector<128x128xf32>
    %cst_104 = arith.constant dense<0.000000e+00> : vector<32x128xf32>
    %104 = tpu.matmul %101, %103, %cst_104 {dimension_numbers = #tpu.dot_dimension_numbers<[1], [0], [0], [1], [0, 0, 1, 1], [], []>} : vector<32x128xf32>, vector<128x128xf32>, vector<32x128xf32> -> vector<32x128xf32>
    %105 = arith.addf %98, %104 : vector<32x128xf32>
    %c14 = arith.constant 14 : index
    %c0_105 = arith.constant 0 : index
    %c0_106 = arith.constant 0 : index
    %106 = vector.load %arg2[%c14, %c0_105, %c0_106] : memref<15x32x32xf32, #tpu.memory_space<vmem>>, vector<1x32x32xf32>
    %107 = vector.shape_cast %106 : vector<1x32x32xf32> to vector<32x32xf32>
    %cst_107 = arith.constant dense<0.000000e+00> : vector<32x128xf32>
    %108 = tpu.matmul %107, %85, %cst_107 {dimension_numbers = #tpu.dot_dimension_numbers<[1], [0], [0], [1], [0, 0, 1, 1], [], []>} : vector<32x32xf32>, vector<32x128xf32>, vector<32x128xf32> -> vector<32x128xf32>
    %c14_108 = arith.constant 14 : index
    %c0_109 = arith.constant 0 : index
    %c0_110 = arith.constant 0 : index
    %109 = vector.load %arg3[%c14_108, %c0_109, %c0_110] : memref<15x128x128xf32, #tpu.memory_space<vmem>>, vector<1x128x128xf32>
    %110 = vector.shape_cast %109 : vector<1x128x128xf32> to vector<128x128xf32>
    %cst_111 = arith.constant dense<0.000000e+00> : vector<32x128xf32>
    %111 = tpu.matmul %108, %110, %cst_111 {dimension_numbers = #tpu.dot_dimension_numbers<[1], [0], [0], [1], [0, 0, 1, 1], [], []>} : vector<32x128xf32>, vector<128x128xf32>, vector<32x128xf32> -> vector<32x128xf32>
    %112 = arith.addf %105, %111 : vector<32x128xf32>
    %c2_112 = arith.constant 2 : index
    %c0_113 = arith.constant 0 : index
    %113 = vector.load %arg4[%c2_112, %c0_113] : memref<3x128xf32, #tpu.memory_space<vmem>>, vector<1x128xf32>
    %114 = vector.broadcast %113 : vector<1x128xf32> to vector<32x128xf32>
    %115 = arith.addf %112, %114 : vector<32x128xf32>
    %cst_114 = arith.constant 0.000000e+00 : f32
    %116 = vector.broadcast %cst_114 : f32 to vector<32x128xf32>
    %117 = arith.maximumf %115, %116 : vector<32x128xf32>
    %c0_115 = arith.constant 0 : index
    %c0_116 = arith.constant 0 : index
    %118 = vector.load %arg5[%c0_115, %c0_116] : memref<128x128xf32, #tpu.memory_space<vmem>>, vector<128x128xf32>
    %cst_117 = arith.constant dense<0.000000e+00> : vector<32x128xf32>
    %119 = tpu.matmul %117, %118, %cst_117 {dimension_numbers = #tpu.dot_dimension_numbers<[1], [0], [0], [1], [0, 0, 1, 1], [], []>} : vector<32x128xf32>, vector<128x128xf32>, vector<32x128xf32> -> vector<32x128xf32>
    %c0_118 = arith.constant 0 : index
    %c0_119 = arith.constant 0 : index
    %120 = vector.load %arg7[%c0_118, %c0_119] : memref<8x32xf32, #tpu.memory_space<vmem>>, vector<8x32xf32>
    %cst_120 = arith.constant dense<0.000000e+00> : vector<8x128xf32>
    %121 = tpu.matmul %120, %119, %cst_120 {dimension_numbers = #tpu.dot_dimension_numbers<[1], [0], [0], [1], [0, 0, 1, 1], [], []>} : vector<8x32xf32>, vector<32x128xf32>, vector<8x128xf32> -> vector<8x128xf32>
    %c0_121 = arith.constant 0 : index
    %c0_122 = arith.constant 0 : index
    %122 = vector.load %arg6[%c0_121, %c0_122] : memref<1x128xf32, #tpu.memory_space<vmem>>, vector<1x128xf32>
    %123 = vector.broadcast %122 : vector<1x128xf32> to vector<8x128xf32>
    %124 = arith.addf %121, %123 : vector<8x128xf32>
    %c0_123 = arith.constant 0 : index
    %c0_124 = arith.constant 0 : index
    %125 = vector.load %arg8[%c0_123, %c0_124] : memref<8x128xf32, #tpu.memory_space<vmem>>, vector<8x128xf32>
    tpu.vector_store %arg8[%c0_123, %c0_124], %124 {strides = array<i32>} : memref<8x128xf32, #tpu.memory_space<vmem>>, vector<8x128xf32>,
    return
  }
  func.func @transform_0(%arg0: i32) -> (i32, i32) {
    %c0_i32 = arith.constant 0 : i32
    %c0_i32_0 = arith.constant 0 : i32
    %c0_i32_1 = arith.constant 0 : i32
    return %c0_i32, %c0_i32_0 : i32, i32
  }
  func.func @transform_1(%arg0: i32) -> (i32, i32, i32) {
    %c0_i32 = arith.constant 0 : i32
    %c0_i32_0 = arith.constant 0 : i32
    %c0_i32_1 = arith.constant 0 : i32
    %c0_i32_2 = arith.constant 0 : i32
    return %c0_i32, %c0_i32_0, %c0_i32_1 : i32, i32, i32
  }
  func.func @transform_2(%arg0: i32) -> (i32, i32, i32) {
    %c0_i32 = arith.constant 0 : i32
    %c0_i32_0 = arith.constant 0 : i32
    %c0_i32_1 = arith.constant 0 : i32
    %c0_i32_2 = arith.constant 0 : i32
    return %c0_i32, %c0_i32_0, %c0_i32_1 : i32, i32, i32
  }
  func.func @transform_3(%arg0: i32) -> (i32, i32) {
    %c0_i32 = arith.constant 0 : i32
    %c0_i32_0 = arith.constant 0 : i32
    %c0_i32_1 = arith.constant 0 : i32
    return %c0_i32, %c0_i32_0 : i32, i32
  }
  func.func @transform_4(%arg0: i32) -> (i32, i32) {
    %c0_i32 = arith.constant 0 : i32
    %c0_i32_0 = arith.constant 0 : i32
    %c0_i32_1 = arith.constant 0 : i32
    return %c0_i32, %c0_i32_0 : i32, i32
  }
  func.func @transform_5(%arg0: i32) -> (i32, i32) {
    %c0_i32 = arith.constant 0 : i32
    %c0_i32_0 = arith.constant 0 : i32
    %c0_i32_1 = arith.constant 0 : i32
    return %c0_i32, %c0_i32_0 : i32, i32
  }
  func.func @transform_6(%arg0: i32) -> (i32, i32) {
    %c0_i32 = arith.constant 0 : i32
    %c0_i32_0 = arith.constant 0 : i32
    %c0_i32_1 = arith.constant 0 : i32
    return %c0_i32, %c0_i32_0 : i32, i32
  }
  func.func @transform_7(%arg0: i32) -> (i32, i32) {
    %c0_i32 = arith.constant 0 : i32
    %c0_i32_0 = arith.constant 0 : i32
    %c0_i32_1 = arith.constant 0 : i32
    return %c0_i32, %c0_i32_0 : i32, i32
  }
}

</mosaic_0001>

<bundles_post_ra>
// kernel: tpu_custom_call.1
= control target key start
LH: loop header
LB: loop body
LE: loop exit
PB: predicated region body
PF: predicated region fallthrough
CT: control target
= control target key end

     0   :  { %12 = vsyncpa [#allocation3], 0  ;;  %s2125_s0 = inlined_call_operand.hbm [shape: f32[32,128], index: 0, kind: input, shape index: {}]   ;;  %s2126_s1 = inlined_call_operand.hbm [shape: f32[15,32,32], index: 1, kind: input, shape index: {}]   ;;  %s2127_s2 = inlined_call_operand.hbm [shape: f32[15,128,128], index: 2, kind: input, shape index: {}]   ;;  %s2128_s3 = inlined_call_operand.hbm [shape: f32[3,128], index: 3, kind: input, shape index: {}]   ;;  %s2129_s4 = inlined_call_operand.hbm [shape: f32[128,128], index: 4, kind: input, shape index: {}]   ;;  %s2130_s5 = inlined_call_operand.vmem [shape: f32[1,128], index: 5, kind: input, shape index: {}]   ;;  %s2131_s6 = inlined_call_operand.hbm [shape: f32[8,32], index: 6, kind: input, shape index: {}]   ;;  %s2132_s7 = inlined_call_operand.hbm [shape: f32[8,128], index: 7, kind: output, shape index: {}]  }
   0x1   :  { %13 = vsyncpa [#allocation6], 0 }
   0x2   :  { %14 = vsyncpa [#allocation9], 0 }
   0x3   :  { %15 = vsyncpa [#allocation12], 0 }
   0x4   :  { %16 = vsyncpa [#allocation4], 0  ;;  %s34_s26 = sshll.u32 %s2126_s1, 4  ;;  %s1928_s27 = smov [#allocation5]   ;;  %s35_s26 = int_to_ptr.hbm [resolvable:$true] %s34_s26 }
   0x5   :  { %s36_s28 = sshll.u32 %s1928_s27, 4  ;;  %s61_s8 = sshll.u32 %s2128_s3, 4  ;;  %s37_s28 = int_to_ptr.vmem [resolvable:$true] %s36_s28  ;;  %s62_s8 = int_to_ptr.hbm [resolvable:$true] %s61_s8 }
   0x6   :  { %s1929_s9 = smov 128   ;;  %s1930_s10 = smov 8  }
   0x7   :  { %42 = dma.hbm_to_vmem [thread:$0]  %s35_s26, 7680, %s37_s28, [#allocation6], %s1929_s9, %s1929_s9, %s1930_s10  }
   0x8   :  { %s1931_s11 = smov [#allocation8]   ;;  %s21_s1 = sshll.u32 %s2125_s0, 4  ;;  %s22_s1 = int_to_ptr.hbm [resolvable:$true] %s21_s1 }
   0x9   :  { %s63_s12 = sshll.u32 %s1931_s11, 4  ;;  %s47_s3 = sshll.u32 %s2127_s2, 4  ;;  %s64_s12 = int_to_ptr.vmem [resolvable:$true] %s63_s12  ;;  %s48_s3 = int_to_ptr.hbm [resolvable:$true] %s47_s3 }
   0xa   :  { %66 = dma.hbm_to_vmem [thread:$0]  %s62_s8, 64, %s64_s12, [#allocation9]  }
   0xb   :  { %s1932_s17 = smov [#allocation2]   ;;  %s1933_s19 = smov [#allocation7]  }
   0xc   :  { %s23_s18 = sshll.u32 %s1932_s17, 4  ;;  %s49_s20 = sshll.u32 %s1933_s19, 4  ;;  %s24_s18 = int_to_ptr.vmem [resolvable:$true] %s23_s18  ;;  %s50_s20 = int_to_ptr.vmem [resolvable:$true] %s49_s20 }
   0xd   :  { %29 = dma.hbm_to_vmem [thread:$0]  %s22_s1, 512, %s24_s18, [#allocation3], %s1929_s9, %s1929_s9, %s1930_s10  }
   0xe   :  { %s71_s0 = sshll.u32 %s2129_s4, 4  ;;  %s87_s24 = sshll.u32 %s2131_s6, 4  ;;  %s72_s0 = int_to_ptr.hbm [resolvable:$true] %s71_s0  ;;  %s88_s24 = int_to_ptr.hbm [resolvable:$true] %s87_s24 }
   0xf   :  { %55 = dma.hbm_to_vmem [thread:$0]  %s48_s3, 30720, %s50_s20, [#allocation6], %s1929_s9, %s1929_s9, %s1930_s10  }
  0x10   :  { %s1934_s25 = smov [#allocation10]   ;;  %s1935_s27 = smov [#allocation11]  }
  0x11   :  { %s73_s26 = sshll.u32 %s1934_s25, 4  ;;  %s89_s4 = sshll.u32 %s1935_s27, 4  ;;  %s74_s26 = int_to_ptr.vmem [resolvable:$true] %s73_s26  ;;  %s90_s4 = int_to_ptr.vmem [resolvable:$true] %s89_s4 }
  0x12   :  { %79 = dma.hbm_to_vmem [thread:$0]  %s72_s0, 2048, %s74_s26, [#allocation9], %s1929_s9, %s1929_s9, %s1930_s10  }
  0x13   :  { %92 = dma.hbm_to_vmem [thread:$0]  %s88_s24, 128, %s90_s4, [#allocation12]  }
  0x14   :  { %1918 = dma.done.wait [#allocation3], 512  }
  0x15   :  { %1919 = vsyncadd [#allocation3], 4294966784 }
  0x16   :  { %1920 = dma.done.wait [#allocation6], 38400  }
  0x17   :  { %1921 = vsyncadd [#allocation6], 4294928896 }
  0x18   :  { %1922 = dma.done.wait [#allocation9], 2112  }
  0x19   :  { %1923 = vsyncadd [#allocation9], 4294965184 }
  0x1a   :  { %1924 = dma.done.wait [#allocation12], 128  }
  0x1b   :  { %1925 = vsyncadd [#allocation12], 4294967168  ;;  %v2007_v0 = vld [vmem:[#allocation2 + $0x18] sm:$0xff]  ;;  %v2009_v1 = vld [vmem:[#allocation2 + $0x10] sm:$0xff]  ;;  %vm125_vm0 = vcmask 261120   ;;  %s1936_s29 = smov [#allocation13]  }
  0x1c   :  { %150 = vmatpush.msra.mxu0 %v2007_v0  ;;  %212 = vmatpush.msra.mxu1 %v2007_v0  ;;  %v2013_v2 = vld [vmem:[#allocation2 + $0x8] sm:$0xff]  ;;  %v2017_v3 = vld [vmem:[#allocation2] sm:$0xff]  ;;  %v182_v4 = vld [vmem:[#allocation7 + $0x78] sm:$0xff]  ;;  %s1645_s30 = sshll.u32 %s1936_s29, 4  ;;  %s1647_s10 = sshll.u32 %s2132_s7, 4  ;;  %s1646_s30 = int_to_ptr.vmem [resolvable:$true] %s1645_s30  ;;  %s1648_s10 = int_to_ptr.hbm [resolvable:$true] %s1647_s10 }
  0x1d   :  { %v121_v5 = vld [vmem:[#allocation5] sm:$0xff]  ;;  %v245_v7 = vld [vmem:[#allocation7 + $0xf8] sm:$0xff]  ;;  %275 = vmatpush.msra.mxu3 %v182_v4  ;;  %v181_v8 = vld [vmem:[#allocation7 + $0x70] sm:$0xff] }
  0x1e   :  { %151 = vmatpush.msra.mxu0 %v2009_v1  ;;  %213 = vmatpush.msra.mxu1 %v2009_v1  ;;  %v184_v6 = vld [vmem:[#allocation5 + $0x20] sm:$0xff]  ;;  %v244_v9 = vld [vmem:[#allocation7 + $0xf0] sm:$0xff]  ;;  %v180_v10 = vld [vmem:[#allocation7 + $0x68] sm:$0xff] }
  0x1f   :  { %1721 = vmatpush.msra.mxu2 %v245_v7  ;;  %276 = vmatpush.msra.mxu3 %v181_v8  ;;  %v243_v11 = vld [vmem:[#allocation7 + $0xe8] sm:$0xff]  ;;  %v179_v12 = vld [vmem:[#allocation7 + $0x60] sm:$0xff]  ;;  %v178_v15 = vld [vmem:[#allocation7 + $0x58] sm:$0xff] }
  0x20   :  { %152 = vmatpush.msra.mxu0 %v2013_v2  ;;  %214 = vmatpush.msra.mxu1 %v2013_v2  ;;  %v122_v13 = vld [vmem:[#allocation5 + $0x8] sm:$0xff]  ;;  %v242_v14 = vld [vmem:[#allocation7 + $0xe0] sm:$0xff]  ;;  %v241_v17 = vld [vmem:[#allocation7 + $0xd8] sm:$0xff] }
  0x21   :  { %1722 = vmatpush.msra.mxu2 %v244_v9  ;;  %277 = vmatpush.msra.mxu3 %v180_v10  ;;  %v185_v16 = vld [vmem:[#allocation5 + $0x28] sm:$0xff]  ;;  %v177_v18 = vld [vmem:[#allocation7 + $0x50] sm:$0xff]  ;;  %v175_v22 = vld [vmem:[#allocation7 + $0x40] sm:$0xff] }
  0x22   :  { %153 = vmatpush.msra.mxu0 %v2017_v3  ;;  %215 = vmatpush.msra.mxu1 %v2017_v3  ;;  %v240_v19 = vld [vmem:[#allocation7 + $0xd0] sm:$0xff]  ;;  %v176_v20 = vld [vmem:[#allocation7 + $0x48] sm:$0xff]  ;;  %v238_v23 = vld [vmem:[#allocation7 + $0xc0] sm:$0xff] }
  0x23   :  { %1660 = vmatmul.msk.f32.vlgmr.msra.gmra.mxu0 %vm125_vm0, %v121_v5  ;;  %1664 = vmatmul.msk.f32.vlgmr.msra.gmra.mxu1 %vm125_vm0, %v184_v6  ;;  %v239_v21 = vld [vmem:[#allocation7 + $0xc8] sm:$0xff]  ;;  %v174_v24 = vld [vmem:[#allocation7 + $0x38] sm:$0xff]  ;;  %v186_v25 = vld [vmem:[#allocation5 + $0x30] sm:$0xff] }
  0x24   :  { %246 = vmatpush.msrb.mxu0 %v245_v7  ;;  %1723 = vmatpush.msra.mxu2 %v243_v11  ;;  %v123_v26 = vld [vmem:[#allocation5 + $0x10] sm:$0xff]  ;;  %v237_v27 = vld [vmem:[#allocation7 + $0xb8] sm:$0xff]  ;;  %v172_v30 = vld [vmem:[#allocation7 + $0x28] sm:$0xff] }
  0x25   :  { %278 = vmatpush.msra.mxu3 %v179_v12  ;;  %v173_v28 = vld [vmem:[#allocation7 + $0x30] sm:$0xff]  ;;  %v235_v31 = vld [vmem:[#allocation7 + $0xa8] sm:$0xff]  ;;  %v171_v32 = vld [vmem:[#allocation7 + $0x20] sm:$0xff] }
  0x26   :  { %247 = vmatpush.msrb.mxu0 %v244_v9  ;;  %1724 = vmatpush.msra.mxu2 %v242_v14  ;;  %v236_v29 = vld [vmem:[#allocation7 + $0xb0] sm:$0xff]  ;;  %v234_v33 = vld [vmem:[#allocation7 + $0xa0] sm:$0xff]  ;;  %v170_v34 = vld [vmem:[#allocation7 + $0x18] sm:$0xff] }
  0x27   :  { %279 = vmatpush.msra.mxu3 %v178_v15  ;;  %v187_v35 = vld [vmem:[#allocation5 + $0x38] sm:$0xff]  ;;  %v169_v38 = vld [vmem:[#allocation7 + $0x10] sm:$0xff]  ;;  %v168_v40 = vld [vmem:[#allocation7 + $0x8] sm:$0xff] }
  0x28   :  { %248 = vmatpush.msrb.mxu0 %v243_v11  ;;  %1725 = vmatpush.msra.mxu2 %v241_v17  ;;  %v124_v36 = vld [vmem:[#allocation5 + $0x18] sm:$0xff]  ;;  %v232_v39 = vld [vmem:[#allocation7 + $0x90] sm:$0xff]  ;;  %v231_v41 = vld [vmem:[#allocation7 + $0x88] sm:$0xff] }
  0x29   :  { %280 = vmatpush.msra.mxu3 %v177_v18  ;;  %v233_v37 = vld [vmem:[#allocation7 + $0x98] sm:$0xff]  ;;  %v230_v42 = vld [vmem:[#allocation7 + $0x80] sm:$0xff]  ;;  %v306_v51 = vld [vmem:[#allocation5 + $0x48] sm:$0xff] }
  0x2a   :  { %249 = vmatpush.msrb.mxu0 %v242_v14  ;;  %1726 = vmatpush.msra.mxu2 %v240_v19  ;;  %v167_v43 = vld [vmem:[#allocation7] sm:$0xff]  ;;  %v307_v54 = vld [vmem:[#allocation5 + $0x50] sm:$0xff]  ;;  %v308_v56 = vld [vmem:[#allocation5 + $0x58] sm:$0xff] }
  0x2b   :  { %1661 = vmatmul.msk.f32.gmra.mxu0 %vm125_vm0, %v122_v13  ;;  %1665 = vmatmul.msk.f32.gmra.mxu1 %vm125_vm0, %v185_v16  ;;  %v305_v48 = vld [vmem:[#allocation5 + $0x40] sm:$0xff]  ;;  %v402_v57 = vld [vmem:[#allocation5 + $0x68] sm:$0xff]  ;;  %v403_v58 = vld [vmem:[#allocation5 + $0x70] sm:$0xff] }
  0x2c   :  { %250 = vmatpush.msrb.mxu0 %v241_v17  ;;  %281 = vmatpush.msra.mxu3 %v176_v20  ;;  %v401_v55 = vld [vmem:[#allocation5 + $0x60] sm:$0xff]  ;;  %v404_v60 = vld [vmem:[#allocation5 + $0x78] sm:$0xff]  ;;  %v498_v61 = vld [vmem:[#allocation5 + $0x88] sm:$0xff] }
  0x2d   :  { %1727 = vmatpush.msra.mxu2 %v239_v21  ;;  %v497_v59 = vld [vmem:[#allocation5 + $0x80] sm:$0xff]  ;;  %v499_v62 = vld [vmem:[#allocation5 + $0x90] sm:$0xff]  ;;  %v364_v4 = vld [vmem:[#allocation7 + $0x168] sm:$0xff] }
  0x2e   :  { %251 = vmatpush.msrb.mxu0 %v240_v19  ;;  %282 = vmatpush.msra.mxu3 %v175_v22  ;;  %v593_v63 = vld [vmem:[#allocation5 + $0xa0] sm:$0xff]  ;;  %v595_v6 = vld [vmem:[#allocation5 + $0xb0] sm:$0xff]  ;;  %v362_v8 = vld [vmem:[#allocation7 + $0x158] sm:$0xff] }
  0x2f   :  { %1728 = vmatpush.msra.mxu2 %v238_v23  ;;  %v363_v5 = vld [vmem:[#allocation7 + $0x160] sm:$0xff]  ;;  %v361_v9 = vld [vmem:[#allocation7 + $0x150] sm:$0xff]  ;;  %v360_v10 = vld [vmem:[#allocation7 + $0x148] sm:$0xff] }
  0x30   :  { %252 = vmatpush.msrb.mxu0 %v239_v21  ;;  %283 = vmatpush.msra.mxu3 %v174_v24  ;;  %v689_v7 = vld [vmem:[#allocation5 + $0xc0] sm:$0xff]  ;;  %v596_v11 = vld [vmem:[#allocation5 + $0xb8] sm:$0xff]  ;;  %v690_v12 = vld [vmem:[#allocation5 + $0xc8] sm:$0xff] }
  0x31   :  { %1729 = vmatpush.msra.mxu2 %v237_v27  ;;  %v359_v13 = vld [vmem:[#allocation7 + $0x140] sm:$0xff]  ;;  %v691_v14 = vld [vmem:[#allocation5 + $0xd0] sm:$0xff]  ;;  %v358_v15 = vld [vmem:[#allocation7 + $0x138] sm:$0xff] }
  0x32   :  { %253 = vmatpush.msrb.mxu0 %v238_v23  ;;  %284 = vmatpush.msra.mxu3 %v173_v28  ;;  %v357_v16 = vld [vmem:[#allocation7 + $0x130] sm:$0xff]  ;;  %v356_v17 = vld [vmem:[#allocation7 + $0x128] sm:$0xff]  ;;  %v355_v18 = vld [vmem:[#allocation7 + $0x120] sm:$0xff] }
  0x33   :  { %1666 = vmatmul.msk.f32.gmra.mxu1 %vm125_vm0, %v186_v25  ;;  %1662 = vmatmul.msk.f32.gmra.mxu0 %vm125_vm0, %v123_v26  ;;  %v462_v19 = vld [vmem:[#allocation7 + $0x1f8] sm:$0xff]  ;;  %v461_v22 = vld [vmem:[#allocation7 + $0x1f0] sm:$0xff]  ;;  %v460_v24 = vld [vmem:[#allocation7 + $0x1e8] sm:$0xff] }
  0x34   :  { %254 = vmatpush.msrb.mxu0 %v237_v27  ;;  %285 = vmatpush.msra.mxu3 %v172_v30  ;;  %v692_v20 = vld [vmem:[#allocation5 + $0xd8] sm:$0xff]  ;;  %v353_v23 = vld [vmem:[#allocation7 + $0x110] sm:$0xff]  ;;  %v352_v25 = vld [vmem:[#allocation7 + $0x108] sm:$0xff] }
  0x35   :  { %1730 = vmatpush.msra.mxu2 %v236_v29  ;;  %v354_v21 = vld [vmem:[#allocation7 + $0x118] sm:$0xff]  ;;  %v459_v26 = vld [vmem:[#allocation7 + $0x1e0] sm:$0xff] }
  0x36   :  { %255 = vmatpush.msrb.mxu0 %v236_v29  ;;  %286 = vmatpush.msra.mxu3 %v171_v32  ;;  %v351_v27 = vld [vmem:[#allocation7 + $0x100] sm:$0xff]  ;;  %v458_v28 = vld [vmem:[#allocation7 + $0x1d8] sm:$0xff]  ;;  %v457_v29 = vld [vmem:[#allocation7 + $0x1d0] sm:$0xff] }
  0x37   :  { %1731 = vmatpush.msra.mxu2 %v235_v31  ;;  %v558_v30 = vld [vmem:[#allocation7 + $0x278] sm:$0xff]  ;;  %v557_v32 = vld [vmem:[#allocation7 + $0x270] sm:$0xff] }
  0x38   :  { %256 = vmatpush.msrb.mxu0 %v235_v31  ;;  %287 = vmatpush.msra.mxu3 %v170_v34  ;;  %v456_v31 = vld [vmem:[#allocation7 + $0x1c8] sm:$0xff] }
  0x39   :  { %1732 = vmatpush.msra.mxu2 %v234_v33  ;;  %v556_v34 = vld [vmem:[#allocation7 + $0x268] sm:$0xff] }
  0x3a   :  { %257 = vmatpush.msrb.mxu0 %v234_v33  ;;  %288 = vmatpush.msra.mxu3 %v169_v38  ;;  %v455_v33 = vld [vmem:[#allocation7 + $0x1c0] sm:$0xff]  ;;  %v554_v38 = vld [vmem:[#allocation7 + $0x258] sm:$0xff] }
  0x3b   :  { %1667 = vmatmul.msk.f32.gmra.mxu1 %vm125_vm0, %v187_v35  ;;  %1663 = vmatmul.msk.f32.gmra.mxu0 %vm125_vm0, %v124_v36  ;;  %v454_v35 = vld [vmem:[#allocation7 + $0x1b8] sm:$0xff]  ;;  %v555_v36 = vld [vmem:[#allocation7 + $0x260] sm:$0xff] }
  0x3c   :  { %258 = vmatpush.msrb.mxu0 %v233_v37  ;;  %289 = vmatpush.msra.mxu3 %v168_v40  ;;  %v553_v40 = vld [vmem:[#allocation7 + $0x250] sm:$0xff] }
  0x3d   :  { %1733 = vmatpush.msra.mxu2 %v233_v37  ;;  %v453_v37 = vld [vmem:[#allocation7 + $0x1b0] sm:$0xff] }
  0x3e   :  { %259 = vmatpush.msrb.mxu0 %v232_v39  ;;  %290 = vmatpush.msra.mxu3 %v167_v43  ;;  %v450_v43 = vld [vmem:[#allocation7 + $0x198] sm:$0xff] }
  0x3f   :  { %1734 = vmatpush.msra.mxu2 %v232_v39  ;;  %v452_v39 = vld [vmem:[#allocation7 + $0x1a8] sm:$0xff] }
  0x40   :  { %260 = vmatpush.msrb.mxu0 %v231_v41  ;;  %463 = vmatpush.msrb.mxu3 %v462_v19 }
  0x41   :  { %1735 = vmatpush.msra.mxu2 %v231_v41  ;;  %v451_v41 = vld [vmem:[#allocation7 + $0x1a0] sm:$0xff] }
  0x42   :  { %261 = vmatpush.msrb.mxu0 %v230_v42  ;;  %464 = vmatpush.msrb.mxu3 %v461_v22  ;;  %v640_v22 = vld [vmem:[#allocation7 + $0x288] sm:$0xff] }
  0x43   :  { %1736 = vmatpush.msra.mxu2 %v230_v42  ;;  %v552_v42 = vld [vmem:[#allocation7 + $0x248] sm:$0xff] }
  0x44   :  { %333 = vmatpush.msra.mxu0 %v2007_v0  ;;  %465 = vmatpush.msrb.mxu3 %v460_v24  ;;  %v639_v24 = vld [vmem:[#allocation7 + $0x280] sm:$0xff] }
  0x45   :  { %429 = vmatpush.msrb.mxu2 %v2007_v0 }
  0x46   :  { %334 = vmatpush.msra.mxu0 %v2009_v1  ;;  %466 = vmatpush.msrb.mxu3 %v459_v26 }
  0x47   :  { %430 = vmatpush.msrb.mxu2 %v2009_v1 }
  0x48   :  { %335 = vmatpush.msra.mxu0 %v2013_v2  ;;  %467 = vmatpush.msrb.mxu3 %v458_v28 }
  0x49   :  { %431 = vmatpush.msrb.mxu2 %v2013_v2 }
  0x4a   :  { %336 = vmatpush.msra.mxu0 %v2017_v3  ;;  %468 = vmatpush.msrb.mxu3 %v457_v29  ;;  %v738_v29 = vld [vmem:[#allocation7 + $0x318] sm:$0xff] }
  0x4b   :  { %432 = vmatpush.msrb.mxu2 %v2017_v3 }
  0x4c   :  { %469 = vmatpush.msrb.mxu3 %v456_v31  ;;  %v736_v31 = vld [vmem:[#allocation7 + $0x308] sm:$0xff] }
  0x4e   :  { %470 = vmatpush.msrb.mxu3 %v455_v33  ;;  %v735_v33 = vld [vmem:[#allocation7 + $0x300] sm:$0xff] }
  0x50   :  { %471 = vmatpush.msrb.mxu3 %v454_v35 }
  0x52   :  { %472 = vmatpush.msrb.mxu3 %v453_v37 }
  0x54   :  { %473 = vmatpush.msrb.mxu3 %v452_v39 }
  0x56   :  { %474 = vmatpush.msrb.mxu3 %v451_v41 }
  0x58   :  { %475 = vmatpush.msrb.mxu3 %v450_v43 }
  0xa0   :  { %v155_v44 = vpop.f32.mrf.mxu0  ;;  %v217_v45 = vpop.f32.mrf.mxu1 }
  0xa1   :  { %262 = vmatmul.f32.vlgmr.msrb.gmra.mxu0 %v217_v45  ;;  %291 = vmatmul.f32.vlgmr.msra.gmra.mxu3 %v155_v44  ;;  %v551_v44 = vld [vmem:[#allocation7 + $0x240] sm:$0xff] }
  0xa2   :  { %525 = vmatpush.msrb.mxu0 %v2007_v0 }
  0xa4   :  { %526 = vmatpush.msrb.mxu0 %v2009_v1 }
  0xa6   :  { %527 = vmatpush.msrb.mxu0 %v2013_v2 }
  0xa8   :  { %v158_v46 = vpop.f32.mrf.mxu0  ;;  %v220_v47 = vpop.f32.mrf.mxu1  ;;  %528 = vmatpush.msrb.mxu0 %v2017_v3 }
  0xa9   :  { %265 = vmatmul.f32.gmra.mxu0 %v220_v47  ;;  %294 = vmatmul.f32.gmra.mxu3 %v158_v46  ;;  %v449_v46 = vld [vmem:[#allocation7 + $0x190] sm:$0xff]  ;;  %v550_v47 = vld [vmem:[#allocation7 + $0x238] sm:$0xff] }
  0xaa   :  { %476 = vmatpush.msrb.mxu3 %v449_v46 }
  0xb0   :  { %v223_v49 = vpop.f32.mrf.mxu1  ;;  %v161_v50 = vpop.f32.mrf.mxu0 }
  0xb1   :  { %268 = vmatmul.f32.vlgmr.msra.gmra.mxu2 %v223_v49  ;;  %1668 = vmatmul.msk.f32.vlgmr.msra.gmra.mxu0 %vm125_vm0, %v305_v48  ;;  %v448_v48 = vld [vmem:[#allocation7 + $0x188] sm:$0xff]  ;;  %v549_v49 = vld [vmem:[#allocation7 + $0x230] sm:$0xff] }
  0xb2   :  { %297 = vmatmul.f32.gmra.mxu3 %v161_v50  ;;  %621 = vmatpush.msra.mxu2 %v2007_v0  ;;  %v447_v50 = vld [vmem:[#allocation7 + $0x180] sm:$0xff] }
  0xb3   :  { %717 = vmatpush.msra.mxu0 %v2007_v0  ;;  %v500_v0 = vld [vmem:[#allocation5 + $0x98] sm:$0xff]  ;;  %477 = vmatpush.msrb.mxu3 %v448_v48 }
  0xb4   :  { %622 = vmatpush.msra.mxu2 %v2009_v1 }
  0xb5   :  { %718 = vmatpush.msra.mxu0 %v2009_v1  ;;  %v594_v1 = vld [vmem:[#allocation5 + $0xa8] sm:$0xff]  ;;  %478 = vmatpush.msrb.mxu3 %v447_v50 }
  0xb6   :  { %623 = vmatpush.msra.mxu2 %v2013_v2 }
  0xb7   :  { %719 = vmatpush.msra.mxu0 %v2013_v2  ;;  %v366_v2 = vld [vmem:[#allocation7 + $0x178] sm:$0xff] }
  0xb8   :  { %v226_v52 = vpop.f32.mrf.mxu1  ;;  %v164_v53 = vpop.f32.mrf.mxu0  ;;  %624 = vmatpush.msra.mxu2 %v2017_v3  ;;  %367 = vmatpush.msrb.mxu1 %v366_v2  ;;  %v648_v2 = vld [vmem:[#allocation7 + $0x2c8] sm:$0xff] }
  0xb9   :  { %271 = vmatmul.f32.gmra.mxu2 %v226_v52  ;;  %1669 = vmatmul.msk.f32.gmra.mxu0 %vm125_vm0, %v306_v51  ;;  %v548_v51 = vld [vmem:[#allocation7 + $0x228] sm:$0xff]  ;;  %v547_v52 = vld [vmem:[#allocation7 + $0x220] sm:$0xff] }
  0xba   :  { %300 = vmatmul.f32.gmra.mxu3 %v164_v53  ;;  %720 = vmatpush.msra.mxu0 %v2017_v3  ;;  %v365_v3 = vld [vmem:[#allocation7 + $0x170] sm:$0xff]  ;;  %v654_v53 = vld [vmem:[#allocation7 + $0x2f8] sm:$0xff] }
  0xbb   :  { %368 = vmatpush.msrb.mxu1 %v365_v3  ;;  %655 = vmatpush.msra.mxu3 %v654_v53  ;;  %v749_v3 = vld [vmem:[#allocation7 + $0x370] sm:$0xff] }
  0xbd   :  { %369 = vmatpush.msrb.mxu1 %v364_v4  ;;  %v647_v4 = vld [vmem:[#allocation7 + $0x2c0] sm:$0xff] }
  0xbf   :  { %370 = vmatpush.msrb.mxu1 %v363_v5  ;;  %v748_v5 = vld [vmem:[#allocation7 + $0x368] sm:$0xff] }
  0xc1   :  { %1670 = vmatmul.msk.f32.gmra.mxu0 %vm125_vm0, %v307_v54  ;;  %1672 = vmatmul.msk.f32.vlgmr.msrb.gmra.mxu2 %vm125_vm0, %v401_v55  ;;  %v546_v55 = vld [vmem:[#allocation7 + $0x218] sm:$0xff] }
  0xc2   :  { %371 = vmatpush.msrb.mxu1 %v362_v8  ;;  %v747_v8 = vld [vmem:[#allocation7 + $0x360] sm:$0xff] }
  0xc4   :  { %372 = vmatpush.msrb.mxu1 %v361_v9 }
  0xc6   :  { %373 = vmatpush.msrb.mxu1 %v360_v10  ;;  %v645_v10 = vld [vmem:[#allocation7 + $0x2b0] sm:$0xff] }
  0xc8   :  { %374 = vmatpush.msrb.mxu1 %v359_v13  ;;  %v745_v13 = vld [vmem:[#allocation7 + $0x350] sm:$0xff] }
  0xc9   :  { %1671 = vmatmul.msk.f32.gmra.mxu0 %vm125_vm0, %v308_v56  ;;  %1673 = vmatmul.msk.f32.gmra.mxu2 %vm125_vm0, %v402_v57  ;;  %v653_v56 = vld [vmem:[#allocation7 + $0x2f0] sm:$0xff] }
  0xca   :  { %375 = vmatpush.msrb.mxu1 %v358_v15  ;;  %v545_v57 = vld [vmem:[#allocation7 + $0x210] sm:$0xff]  ;;  %656 = vmatpush.msra.mxu3 %v653_v56  ;;  %v744_v15 = vld [vmem:[#allocation7 + $0x348] sm:$0xff] }
  0xcc   :  { %376 = vmatpush.msrb.mxu1 %v357_v16 }
  0xce   :  { %377 = vmatpush.msrb.mxu1 %v356_v17  ;;  %v642_v17 = vld [vmem:[#allocation7 + $0x298] sm:$0xff] }
  0xd0   :  { %378 = vmatpush.msrb.mxu1 %v355_v18  ;;  %v743_v18 = vld [vmem:[#allocation7 + $0x340] sm:$0xff] }
  0xd1   :  { %1674 = vmatmul.msk.f32.gmra.mxu2 %vm125_vm0, %v403_v58  ;;  %1676 = vmatmul.msk.f32.vlgmr.msrb.gmra.mxu0 %vm125_vm0, %v497_v59  ;;  %v652_v58 = vld [vmem:[#allocation7 + $0x2e8] sm:$0xff] }
  0xd2   :  { %379 = vmatpush.msrb.mxu1 %v354_v21  ;;  %657 = vmatpush.msra.mxu3 %v652_v58  ;;  %v544_v59 = vld [vmem:[#allocation7 + $0x208] sm:$0xff]  ;;  %v742_v21 = vld [vmem:[#allocation7 + $0x338] sm:$0xff] }
  0xd4   :  { %380 = vmatpush.msrb.mxu1 %v353_v23  ;;  %v741_v23 = vld [vmem:[#allocation7 + $0x330] sm:$0xff] }
  0xd6   :  { %381 = vmatpush.msrb.mxu1 %v352_v25  ;;  %v740_v25 = vld [vmem:[#allocation7 + $0x328] sm:$0xff] }
  0xd8   :  { %382 = vmatpush.msrb.mxu1 %v351_v27  ;;  %v739_v27 = vld [vmem:[#allocation7 + $0x320] sm:$0xff] }
  0xd9   :  { %1675 = vmatmul.msk.f32.gmra.mxu2 %vm125_vm0, %v404_v60  ;;  %1677 = vmatmul.msk.f32.gmra.mxu0 %vm125_vm0, %v498_v61  ;;  %v651_v60 = vld [vmem:[#allocation7 + $0x2e0] sm:$0xff] }
  0xda   :  { %559 = vmatpush.msra.mxu1 %v558_v30  ;;  %658 = vmatpush.msra.mxu3 %v651_v60  ;;  %v543_v61 = vld [vmem:[#allocation7 + $0x200] sm:$0xff]  ;;  %v737_v30 = vld [vmem:[#allocation7 + $0x310] sm:$0xff] }
  0xdc   :  { %560 = vmatpush.msra.mxu1 %v557_v32 }
  0xde   :  { %561 = vmatpush.msra.mxu1 %v556_v34 }
  0xe0   :  { %562 = vmatpush.msra.mxu1 %v555_v36 }
  0xe1   :  { %1678 = vmatmul.msk.f32.gmra.mxu0 %vm125_vm0, %v499_v62  ;;  %1680 = vmatmul.msk.f32.vlgmr.msra.gmra.mxu2 %vm125_vm0, %v593_v63  ;;  %v650_v62 = vld [vmem:[#allocation7 + $0x2d8] sm:$0xff] }
  0xe2   :  { %563 = vmatpush.msra.mxu1 %v554_v38  ;;  %659 = vmatpush.msra.mxu3 %v650_v62  ;;  %v917_v62 = vld [vmem:[#allocation7 + $0x468] sm:$0xff] }
  0xe4   :  { %564 = vmatpush.msra.mxu1 %v553_v40 }
  0xe6   :  { %565 = vmatpush.msra.mxu1 %v552_v42 }
  0xe8   :  { %566 = vmatpush.msra.mxu1 %v551_v44 }
  0xe9   :  { %1679 = vmatmul.msk.f32.gmra.mxu0 %vm125_vm0, %v500_v0  ;;  %1681 = vmatmul.msk.f32.gmra.mxu2 %vm125_vm0, %v594_v1  ;;  %v649_v0 = vld [vmem:[#allocation7 + $0x2d0] sm:$0xff]  ;;  %v750_v1 = vld [vmem:[#allocation7 + $0x378] sm:$0xff] }
  0xea   :  { %567 = vmatpush.msra.mxu1 %v550_v47  ;;  %660 = vmatpush.msra.mxu3 %v649_v0  ;;  %v916_v0 = vld [vmem:[#allocation7 + $0x460] sm:$0xff] }
  0xec   :  { %568 = vmatpush.msra.mxu1 %v549_v49  ;;  %661 = vmatpush.msra.mxu3 %v648_v2 }
  0xee   :  { %569 = vmatpush.msra.mxu1 %v548_v51  ;;  %662 = vmatpush.msra.mxu3 %v647_v4  ;;  %v913_v4 = vld [vmem:[#allocation7 + $0x448] sm:$0xff] }
  0xf0   :  { %570 = vmatpush.msra.mxu1 %v547_v52 }
  0xf1   :  { %1682 = vmatmul.msk.f32.gmra.mxu2 %vm125_vm0, %v595_v6  ;;  %1684 = vmatmul.msk.f32.vlgmr.msra.gmra.mxu0 %vm125_vm0, %v689_v7  ;;  %v646_v7 = vld [vmem:[#allocation7 + $0x2b8] sm:$0xff] }
  0xf2   :  { %571 = vmatpush.msra.mxu1 %v546_v55  ;;  %663 = vmatpush.msra.mxu3 %v646_v7  ;;  %v912_v7 = vld [vmem:[#allocation7 + $0x440] sm:$0xff] }
  0xf4   :  { %572 = vmatpush.msra.mxu1 %v545_v57  ;;  %664 = vmatpush.msra.mxu3 %v645_v10  ;;  %v910_v10 = vld [vmem:[#allocation7 + $0x430] sm:$0xff] }
  0xf6   :  { %573 = vmatpush.msra.mxu1 %v544_v59  ;;  %v919_v59 = vld [vmem:[#allocation7 + $0x478] sm:$0xff] }
  0xf7   :  { %920 = vmatpush.msrb.mxu0 %v919_v59  ;;  %v795_v59 = vld [vmem:[#allocation5 + $0xe0] sm:$0xff] }
  0xf8   :  { %574 = vmatpush.msra.mxu1 %v543_v61  ;;  %v918_v61 = vld [vmem:[#allocation7 + $0x470] sm:$0xff] }
  0xf9   :  { %1683 = vmatmul.msk.f32.gmra.mxu2 %vm125_vm0, %v596_v11  ;;  %1685 = vmatmul.msk.f32.gmra.mxu0 %vm125_vm0, %v690_v12  ;;  %v746_v11 = vld [vmem:[#allocation7 + $0x358] sm:$0xff]  ;;  %v644_v12 = vld [vmem:[#allocation7 + $0x2a8] sm:$0xff] }
  0xfa   :  { %665 = vmatpush.msra.mxu3 %v644_v12  ;;  %921 = vmatpush.msrb.mxu0 %v918_v61  ;;  %v796_v61 = vld [vmem:[#allocation5 + $0xe8] sm:$0xff] }
  0xfc   :  { %922 = vmatpush.msrb.mxu0 %v917_v62  ;;  %v859_v62 = vld [vmem:[#allocation5 + $0x108] sm:$0xff] }
  0xfe   :  { %923 = vmatpush.msrb.mxu0 %v916_v0  ;;  %v860_v0 = vld [vmem:[#allocation5 + $0x110] sm:$0xff] }
 0x101   :  { %1686 = vmatmul.msk.f32.gmra.mxu0 %vm125_vm0, %v691_v14  ;;  %v643_v14 = vld [vmem:[#allocation7 + $0x2a0] sm:$0xff] }
 0x102   :  { %666 = vmatpush.msra.mxu3 %v643_v14  ;;  %v907_v14 = vld [vmem:[#allocation7 + $0x418] sm:$0xff] }
 0x104   :  { %667 = vmatpush.msra.mxu3 %v642_v17  ;;  %v906_v17 = vld [vmem:[#allocation7 + $0x410] sm:$0xff] }
 0x109   :  { %1687 = vmatmul.msk.f32.gmra.mxu0 %vm125_vm0, %v692_v20  ;;  %v641_v20 = vld [vmem:[#allocation7 + $0x290] sm:$0xff] }
 0x10a   :  { %668 = vmatpush.msra.mxu3 %v641_v20  ;;  %v904_v20 = vld [vmem:[#allocation7 + $0x400] sm:$0xff] }
 0x10c   :  { %669 = vmatpush.msra.mxu3 %v640_v22 }
 0x10e   :  { %670 = vmatpush.msra.mxu3 %v639_v24 }
 0x11e   :  { %v2071_v45 = vpop.f32.mrf.mxu0 }
 0x124   :  { %v292_v49 = vpop.f32.mrf.mxu3 }
 0x126   :  { %v2073_v54 = vpop.f32.mrf.mxu0 }
 0x12c   :  { %v295_v51 = vpop.f32.mrf.mxu3 }
 0x12e   :  { %v338_v63 = vpop.f32.mrf.mxu0 }
 0x12f   :  { %383 = vmatmul.f32.vlgmr.msrb.gmra.mxu1 %v338_v63 }
 0x130   :  { %751 = vmatpush.msrb.mxu1 %v750_v1  ;;  %v915_v1 = vld [vmem:[#allocation7 + $0x458] sm:$0xff] }
 0x131   :  { %924 = vmatpush.msrb.mxu0 %v915_v1  ;;  %v798_v1 = vld [vmem:[#allocation5 + $0xf8] sm:$0xff] }
 0x132   :  { %752 = vmatpush.msrb.mxu1 %v749_v3  ;;  %v914_v3 = vld [vmem:[#allocation7 + $0x450] sm:$0xff] }
 0x133   :  { %925 = vmatpush.msrb.mxu0 %v914_v3  ;;  %v856_v3 = vld [vmem:[#allocation7 + $0x3f8] sm:$0xff] }
 0x134   :  { %v2075_v6 = vpop.f32.mrf.mxu2  ;;  %753 = vmatpush.msrb.mxu1 %v748_v5 }
 0x135   :  { %v298_v53 = vpop.f32.mrf.mxu3  ;;  %926 = vmatpush.msrb.mxu0 %v913_v4  ;;  %v855_v4 = vld [vmem:[#allocation7 + $0x3f0] sm:$0xff] }
 0x136   :  { %v341_v9 = vpop.f32.mrf.mxu0  ;;  %754 = vmatpush.msrb.mxu1 %v747_v8  ;;  %v911_v8 = vld [vmem:[#allocation7 + $0x438] sm:$0xff] }
 0x137   :  { %386 = vmatmul.f32.gmra.mxu1 %v341_v9  ;;  %927 = vmatpush.msrb.mxu0 %v912_v7  ;;  %v853_v7 = vld [vmem:[#allocation7 + $0x3e0] sm:$0xff] }
 0x138   :  { %755 = vmatpush.msrb.mxu1 %v746_v11  ;;  %v909_v11 = vld [vmem:[#allocation7 + $0x428] sm:$0xff] }
 0x139   :  { %928 = vmatpush.msrb.mxu0 %v911_v8  ;;  %v979_v8 = vld [vmem:[#allocation5 + $0x120] sm:$0xff] }
 0x13a   :  { %756 = vmatpush.msrb.mxu1 %v745_v13  ;;  %v908_v13 = vld [vmem:[#allocation7 + $0x420] sm:$0xff] }
 0x13b   :  { %929 = vmatpush.msrb.mxu0 %v910_v10  ;;  %v851_v10 = vld [vmem:[#allocation7 + $0x3d0] sm:$0xff] }
 0x13c   :  { %v2077_v16 = vpop.f32.mrf.mxu2  ;;  %757 = vmatpush.msrb.mxu1 %v744_v15 }
 0x13d   :  { %v301_v56 = vpop.f32.mrf.mxu3  ;;  %930 = vmatpush.msrb.mxu0 %v909_v11  ;;  %v850_v11 = vld [vmem:[#allocation7 + $0x3c8] sm:$0xff] }
 0x13e   :  { %v344_v19 = vpop.f32.mrf.mxu0  ;;  %758 = vmatpush.msrb.mxu1 %v743_v18  ;;  %v905_v18 = vld [vmem:[#allocation7 + $0x408] sm:$0xff] }
 0x13f   :  { %389 = vmatmul.f32.gmra.mxu1 %v344_v19  ;;  %931 = vmatpush.msrb.mxu0 %v908_v13  ;;  %v980_v13 = vld [vmem:[#allocation5 + $0x128] sm:$0xff] }
 0x140   :  { %759 = vmatpush.msrb.mxu1 %v742_v21 }
 0x141   :  { %932 = vmatpush.msrb.mxu0 %v907_v14  ;;  %v848_v14 = vld [vmem:[#allocation7 + $0x3b8] sm:$0xff] }
 0x142   :  { %760 = vmatpush.msrb.mxu1 %v741_v23 }
 0x143   :  { %933 = vmatpush.msrb.mxu0 %v906_v17  ;;  %v846_v17 = vld [vmem:[#allocation7 + $0x3a8] sm:$0xff] }
 0x144   :  { %v434_v26 = vpop.f32.mrf.mxu2  ;;  %761 = vmatpush.msrb.mxu1 %v740_v25  ;;  %v299_v25 = vadd.f32 %v298_v53, %v2075_v6 }
 0x145   :  { %479 = vmatmul.f32.vlgmr.msrb.gmra.mxu3 %v434_v26  ;;  %934 = vmatpush.msrb.mxu0 %v905_v18  ;;  %v296_v26 = vadd.f32 %v295_v51, %v2073_v54  ;;  %v845_v18 = vld [vmem:[#allocation7 + $0x3a0] sm:$0xff] }
 0x146   :  { %v347_v28 = vpop.f32.mrf.mxu0  ;;  %762 = vmatpush.msrb.mxu1 %v739_v27  ;;  %v302_v27 = vadd.f32 %v301_v56, %v2077_v16 }
 0x147   :  { %392 = vmatmul.f32.gmra.mxu1 %v347_v28  ;;  %935 = vmatpush.msrb.mxu0 %v904_v20  ;;  %v844_v20 = vld [vmem:[#allocation7 + $0x398] sm:$0xff] }
 0x148   :  { %763 = vmatpush.msrb.mxu1 %v738_v29 }
 0x14a   :  { %764 = vmatpush.msrb.mxu1 %v737_v30  ;;  %v293_v30 = vadd.f32 %v292_v49, %v2071_v45 }
 0x14c   :  { %v437_v32 = vpop.f32.mrf.mxu2  ;;  %765 = vmatpush.msrb.mxu1 %v736_v31 }
 0x14d   :  { %482 = vmatmul.f32.gmra.mxu3 %v437_v32 }
 0x14e   :  { %v530_v34 = vpop.f32.mrf.mxu0  ;;  %766 = vmatpush.msrb.mxu1 %v735_v33 }
 0x14f   :  { %575 = vmatmul.f32.vlgmr.msra.gmra.mxu1 %v530_v34 }
 0x150   :  { %949 = vmatpush.msra.mxu1 %v856_v3  ;;  %v1124_v3 = vld [vmem:[#allocation7 + $0x518] sm:$0xff] }
 0x152   :  { %950 = vmatpush.msra.mxu1 %v855_v4  ;;  %v1123_v4 = vld [vmem:[#allocation7 + $0x510] sm:$0xff] }
 0x154   :  { %v440_v35 = vpop.f32.mrf.mxu2 }
 0x155   :  { %485 = vmatmul.f32.gmra.mxu3 %v440_v35 }
 0x156   :  { %v533_v36 = vpop.f32.mrf.mxu0 }
 0x157   :  { %578 = vmatmul.f32.gmra.mxu1 %v533_v36 }
 0x15c   :  { %v443_v37 = vpop.f32.mrf.mxu2 }
 0x15d   :  { %488 = vmatmul.f32.gmra.mxu3 %v443_v37 }
 0x15e   :  { %v536_v38 = vpop.f32.mrf.mxu0 }
 0x15f   :  { %581 = vmatmul.f32.gmra.mxu1 %v536_v38 }
 0x164   :  { %v626_v39 = vpop.f32.mrf.mxu2 }
 0x165   :  { %671 = vmatmul.f32.vlgmr.msra.gmra.mxu3 %v626_v39 }
 0x166   :  { %v539_v40 = vpop.f32.mrf.mxu0 }
 0x167   :  { %584 = vmatmul.f32.gmra.mxu1 %v539_v40 }
 0x16c   :  { %v629_v41 = vpop.f32.mrf.mxu2 }
 0x16d   :  { %674 = vmatmul.f32.gmra.mxu3 %v629_v41 }
 0x16e   :  { %v722_v42 = vpop.f32.mrf.mxu0 }
 0x16f   :  { %767 = vmatmul.f32.vlgmr.msrb.gmra.mxu1 %v722_v42 }
 0x174   :  { %v632_v43 = vpop.f32.mrf.mxu2 }
 0x175   :  { %677 = vmatmul.f32.gmra.mxu3 %v632_v43 }
 0x176   :  { %v725_v44 = vpop.f32.mrf.mxu0 }
 0x177   :  { %770 = vmatmul.f32.gmra.mxu1 %v725_v44 }
 0x17c   :  { %v635_v46 = vpop.f32.mrf.mxu2 }
 0x17d   :  { %680 = vmatmul.f32.gmra.mxu3 %v635_v46 }
 0x17e   :  { %v728_v47 = vpop.f32.mrf.mxu0 }
 0x17f   :  { %773 = vmatmul.f32.gmra.mxu1 %v728_v47  ;;  %v1746_v47 = vld [vmem:[#allocation8] ss:$0 sm:$0xff] }
 0x186   :  { %v731_v48 = vpop.f32.mrf.mxu0 }
 0x187   :  { %776 = vmatmul.f32.gmra.mxu1 %v731_v48 }
 0x1ac   :  { %v384_v50 = vpop.f32.mrf.mxu1 }
 0x1ad   :  { %v396_v34 = vadd.f32 %v384_v50, %v293_v30  ;;  %v1035_v30 = vld [vmem:[#allocation7 + $0x4d0] sm:$0xff] }
 0x1b4   :  { %v387_v52 = vpop.f32.mrf.mxu1 }
 0x1b5   :  { %v397_v31 = vadd.f32 %v387_v52, %v296_v26  ;;  %v1039_v26 = vld [vmem:[#allocation7 + $0x4f0] sm:$0xff] }
 0x1bc   :  { %v390_v55 = vpop.f32.mrf.mxu1 }
 0x1bd   :  { %v398_v28 = vadd.f32 %v390_v55, %v299_v25  ;;  %v1040_v25 = vld [vmem:[#allocation7 + $0x4f8] sm:$0xff] }
 0x1c4   :  { %v393_v57 = vpop.f32.mrf.mxu1 }
 0x1c5   :  { %v399_v32 = vadd.f32 %v393_v57, %v302_v27  ;;  %v1038_v27 = vld [vmem:[#allocation7 + $0x4e8] sm:$0xff] }
 0x1c8   :  { %v480_v58 = vpop.f32.mrf.mxu3 }
 0x1c9   :  { %v492_v39 = vadd.f32 %v480_v58, %v396_v34  ;;  %v1031_v34 = vld [vmem:[#allocation7 + $0x4b0] sm:$0xff] }
 0x1cc   :  { %v576_v60 = vpop.f32.mrf.mxu1 }
 0x1cd   :  { %v588_v42 = vadd.f32 %v576_v60, %v492_v39  ;;  %v858_v60 = vld [vmem:[#allocation5 + $0x100] sm:$0xff]  ;;  %v1026_v39 = vld [vmem:[#allocation7 + $0x488] sm:$0xff] }
 0x1d0   :  { %v483_v63 = vpop.f32.mrf.mxu3 }
 0x1d1   :  { %v493_v35 = vadd.f32 %v483_v63, %v397_v31  ;;  %v797_v63 = vld [vmem:[#allocation5 + $0xf0] sm:$0xff]  ;;  %v1034_v31 = vld [vmem:[#allocation7 + $0x4c8] sm:$0xff] }
 0x1d4   :  { %v579_v2 = vpop.f32.mrf.mxu1 }
 0x1d5   :  { %v589_v40 = vadd.f32 %v579_v2, %v493_v35  ;;  %v861_v2 = vld [vmem:[#allocation5 + $0x118] sm:$0xff]  ;;  %v1030_v35 = vld [vmem:[#allocation7 + $0x4a8] sm:$0xff] }
 0x1d8   :  { %v486_v5 = vpop.f32.mrf.mxu3 }
 0x1d9   :  { %v494_v33 = vadd.f32 %v486_v5, %v398_v28  ;;  %v854_v5 = vld [vmem:[#allocation7 + $0x3e8] sm:$0xff]  ;;  %v1037_v28 = vld [vmem:[#allocation7 + $0x4e0] sm:$0xff] }
 0x1da   :  { %951 = vmatpush.msra.mxu1 %v854_v5  ;;  %v1122_v5 = vld [vmem:[#allocation7 + $0x508] sm:$0xff] }
 0x1dc   :  { %v582_v9 = vpop.f32.mrf.mxu1  ;;  %952 = vmatpush.msra.mxu1 %v853_v7  ;;  %v1121_v7 = vld [vmem:[#allocation7 + $0x500] sm:$0xff] }
 0x1dd   :  { %v590_v36 = vadd.f32 %v582_v9, %v494_v33  ;;  %v852_v9 = vld [vmem:[#allocation7 + $0x3d8] sm:$0xff] }
 0x1de   :  { %953 = vmatpush.msra.mxu1 %v852_v9  ;;  %v1032_v33 = vld [vmem:[#allocation7 + $0x4b8] sm:$0xff] }
 0x1e0   :  { %v489_v12 = vpop.f32.mrf.mxu3  ;;  %954 = vmatpush.msra.mxu1 %v851_v10 }
 0x1e1   :  { %v495_v37 = vadd.f32 %v489_v12, %v399_v32  ;;  %v849_v12 = vld [vmem:[#allocation7 + $0x3c0] sm:$0xff] }
 0x1e2   :  { %955 = vmatpush.msra.mxu1 %v850_v11  ;;  %v1033_v32 = vld [vmem:[#allocation7 + $0x4c0] sm:$0xff] }
 0x1e4   :  { %v585_v15 = vpop.f32.mrf.mxu1  ;;  %956 = vmatpush.msra.mxu1 %v849_v12 }
 0x1e5   :  { %v591_v41 = vadd.f32 %v585_v15, %v495_v37  ;;  %v847_v15 = vld [vmem:[#allocation7 + $0x3b0] sm:$0xff]  ;;  %v1028_v37 = vld [vmem:[#allocation7 + $0x498] sm:$0xff] }
 0x1e6   :  { %957 = vmatpush.msra.mxu1 %v848_v14 }
 0x1e8   :  { %v672_v19 = vpop.f32.mrf.mxu3  ;;  %958 = vmatpush.msra.mxu1 %v847_v15 }
 0x1e9   :  { %v684_v46 = vadd.f32 %v672_v19, %v588_v42  ;;  %v981_v19 = vld [vmem:[#allocation5 + $0x130] sm:$0xff] }
 0x1ea   :  { %959 = vmatpush.msra.mxu1 %v846_v17 }
 0x1ec   :  { %v768_v21 = vpop.f32.mrf.mxu1  ;;  %960 = vmatpush.msra.mxu1 %v845_v18  ;;  %v1305_v18 = vld [vmem:[#allocation7 + $0x678] sm:$0xff] }
 0x1ed   :  { %v780_v49 = vadd.f32 %v768_v21, %v684_v46  ;;  %v843_v21 = vld [vmem:[#allocation7 + $0x390] sm:$0xff] }
 0x1ee   :  { %961 = vmatpush.msra.mxu1 %v844_v20  ;;  %v1303_v20 = vld [vmem:[#allocation7 + $0x668] sm:$0xff] }
 0x1ef   :  { %v786_v55 = vadd.f32 %v1746_v47, %v780_v49 }
 0x1f0   :  { %v675_v22 = vpop.f32.mrf.mxu3  ;;  %962 = vmatpush.msra.mxu1 %v843_v21 }
 0x1f1   :  { %v685_v54 = vadd.f32 %v675_v22, %v589_v40  ;;  %v790_v58 = vmax.f32 %v786_v55, 0.0  ;;  %v842_v22 = vld [vmem:[#allocation7 + $0x388] sm:$0xff]  ;;  %v1136_v55 = vld [vmem:[#allocation7 + $0x578] sm:$0xff] }
 0x1f2   :  { %963 = vmatpush.msra.mxu1 %v842_v22  ;;  %v1302_v22 = vld [vmem:[#allocation7 + $0x660] sm:$0xff] }
 0x1f4   :  { %v771_v23 = vpop.f32.mrf.mxu1 }
 0x1f5   :  { %v781_v45 = vadd.f32 %v771_v23, %v685_v54  ;;  %v982_v23 = vld [vmem:[#allocation5 + $0x138] sm:$0xff] }
 0x1f7   :  { %v787_v52 = vadd.f32 %v1746_v47, %v781_v45 }
 0x1f8   :  { %v678_v24 = vpop.f32.mrf.mxu3 }
 0x1f9   :  { %v686_v6 = vadd.f32 %v678_v24, %v590_v36  ;;  %v791_v57 = vmax.f32 %v787_v52, 0.0  ;;  %v841_v24 = vld [vmem:[#allocation7 + $0x380] sm:$0xff]  ;;  %v1078_v52 = vld [vmem:[#allocation5 + $0x158] sm:$0xff] }
 0x1fa   :  { %964 = vmatpush.msra.mxu1 %v841_v24  ;;  %v1029_v36 = vld [vmem:[#allocation7 + $0x4a0] sm:$0xff]  ;;  %v1300_v24 = vld [vmem:[#allocation7 + $0x650] sm:$0xff] }
 0x1fc   :  { %v774_v29 = vpop.f32.mrf.mxu1  ;;  %1137 = vmatpush.msrb.mxu1 %v1136_v55 }
 0x1fd   :  { %v782_v43 = vadd.f32 %v774_v29, %v686_v6  ;;  %v1036_v29 = vld [vmem:[#allocation7 + $0x4d8] sm:$0xff] }
 0x1ff   :  { %v788_v51 = vadd.f32 %v1746_v47, %v782_v43 }
 0x200   :  { %v681_v38 = vpop.f32.mrf.mxu3 }
 0x201   :  { %v687_v16 = vadd.f32 %v681_v38, %v591_v41  ;;  %v792_v56 = vmax.f32 %v788_v51, 0.0  ;;  %v1027_v38 = vld [vmem:[#allocation7 + $0x490] sm:$0xff]  ;;  %v1025_v41 = vld [vmem:[#allocation7 + $0x480] sm:$0xff] }
 0x202   :  { %v1077_v51 = vld [vmem:[#allocation5 + $0x150] sm:$0xff] }
 0x204   :  { %v777_v44 = vpop.f32.mrf.mxu1 }
 0x205   :  { %v783_v48 = vadd.f32 %v777_v44, %v687_v16 }
 0x207   :  { %v789_v50 = vadd.f32 %v1746_v47, %v783_v48  ;;  %v1075_v47 = vld [vmem:[#allocation5 + $0x140] sm:$0xff]  ;;  %v1076_v48 = vld [vmem:[#allocation5 + $0x148] sm:$0xff] }
 0x209   :  { %v793_v53 = vmax.f32 %v789_v50, 0.0 }
 0x20b   :  { %823 = vmatpush.msrb.mxu2 %v793_v53  ;;  %886 = vmatpush.msrb.mxu3 %v793_v53 }
 0x20c   :  { %1103 = vmatpush.msra.mxu0 %v793_v53 }
 0x20d   :  { %824 = vmatpush.msrb.mxu2 %v792_v56  ;;  %887 = vmatpush.msrb.mxu3 %v792_v56 }
 0x20e   :  { %1104 = vmatpush.msra.mxu0 %v792_v56 }
 0x20f   :  { %825 = vmatpush.msrb.mxu2 %v791_v57  ;;  %888 = vmatpush.msrb.mxu3 %v791_v57 }
 0x210   :  { %1105 = vmatpush.msra.mxu0 %v791_v57 }
 0x211   :  { %826 = vmatpush.msrb.mxu2 %v790_v58  ;;  %889 = vmatpush.msrb.mxu3 %v790_v58 }
 0x212   :  { %1106 = vmatpush.msra.mxu0 %v790_v58  ;;  %1688 = vmatmul.msk.f32.vlgmr.msrb.gmra.mxu2 %vm125_vm0, %v795_v59  ;;  %v1132_v59 = vld [vmem:[#allocation7 + $0x558] sm:$0xff] }
 0x213   :  { %1692 = vmatmul.msk.f32.vlgmr.msrb.gmra.mxu3 %vm125_vm0, %v858_v60  ;;  %1007 = vmatpush.msra.mxu2 %v793_v53  ;;  %v1131_v60 = vld [vmem:[#allocation7 + $0x550] sm:$0xff] }
 0x214   :  { %1041 = vmatpush.msra.mxu3 %v1040_v25  ;;  %v1299_v25 = vld [vmem:[#allocation7 + $0x648] sm:$0xff] }
 0x215   :  { %1008 = vmatpush.msra.mxu2 %v792_v56  ;;  %v1135_v56 = vld [vmem:[#allocation7 + $0x570] sm:$0xff] }
 0x216   :  { %1042 = vmatpush.msra.mxu3 %v1039_v26  ;;  %1138 = vmatpush.msrb.mxu1 %v1135_v56  ;;  %v1298_v26 = vld [vmem:[#allocation7 + $0x640] sm:$0xff] }
 0x217   :  { %1009 = vmatpush.msra.mxu2 %v791_v57  ;;  %v1134_v57 = vld [vmem:[#allocation7 + $0x568] sm:$0xff] }
 0x218   :  { %1043 = vmatpush.msra.mxu3 %v1038_v27  ;;  %1139 = vmatpush.msrb.mxu1 %v1134_v57 }
 0x219   :  { %1010 = vmatpush.msra.mxu2 %v790_v58  ;;  %v1133_v58 = vld [vmem:[#allocation7 + $0x560] sm:$0xff] }
 0x21a   :  { %1689 = vmatmul.msk.f32.gmra.mxu2 %vm125_vm0, %v796_v61  ;;  %1044 = vmatpush.msra.mxu3 %v1037_v28  ;;  %v1130_v61 = vld [vmem:[#allocation7 + $0x548] sm:$0xff]  ;;  %v1297_v28 = vld [vmem:[#allocation7 + $0x638] sm:$0xff] }
 0x21b   :  { %1693 = vmatmul.msk.f32.gmra.mxu3 %vm125_vm0, %v859_v62  ;;  %1140 = vmatpush.msrb.mxu1 %v1133_v58  ;;  %v1129_v62 = vld [vmem:[#allocation7 + $0x540] sm:$0xff] }
 0x21c   :  { %1045 = vmatpush.msra.mxu3 %v1036_v29  ;;  %v1296_v29 = vld [vmem:[#allocation7 + $0x630] sm:$0xff] }
 0x21d   :  { %1141 = vmatpush.msrb.mxu1 %v1132_v59 }
 0x21e   :  { %1046 = vmatpush.msra.mxu3 %v1035_v30  ;;  %v1295_v30 = vld [vmem:[#allocation7 + $0x628] sm:$0xff] }
 0x21f   :  { %1142 = vmatpush.msrb.mxu1 %v1131_v60 }
 0x220   :  { %1047 = vmatpush.msra.mxu3 %v1034_v31  ;;  %v1294_v31 = vld [vmem:[#allocation7 + $0x620] sm:$0xff] }
 0x221   :  { %1143 = vmatpush.msrb.mxu1 %v1130_v61 }
 0x222   :  { %1690 = vmatmul.msk.f32.gmra.mxu2 %vm125_vm0, %v797_v63  ;;  %1048 = vmatpush.msra.mxu3 %v1033_v32  ;;  %v1128_v63 = vld [vmem:[#allocation7 + $0x538] sm:$0xff] }
 0x223   :  { %1694 = vmatmul.msk.f32.gmra.mxu3 %vm125_vm0, %v860_v0  ;;  %1144 = vmatpush.msrb.mxu1 %v1129_v62  ;;  %v1127_v0 = vld [vmem:[#allocation7 + $0x530] sm:$0xff] }
 0x224   :  { %1049 = vmatpush.msra.mxu3 %v1032_v33  ;;  %v1293_v33 = vld [vmem:[#allocation7 + $0x618] sm:$0xff] }
 0x225   :  { %1145 = vmatpush.msrb.mxu1 %v1128_v63 }
 0x226   :  { %1050 = vmatpush.msra.mxu3 %v1031_v34 }
 0x227   :  { %1146 = vmatpush.msrb.mxu1 %v1127_v0  ;;  %v1181_v0 = vld [vmem:[#allocation5 + $0x160] sm:$0xff] }
 0x228   :  { %1051 = vmatpush.msra.mxu3 %v1030_v35  ;;  %v1292_v35 = vld [vmem:[#allocation7 + $0x610] sm:$0xff] }
 0x22a   :  { %1691 = vmatmul.msk.f32.gmra.mxu2 %vm125_vm0, %v798_v1  ;;  %1052 = vmatpush.msra.mxu3 %v1029_v36  ;;  %v1126_v1 = vld [vmem:[#allocation7 + $0x528] sm:$0xff] }
 0x22b   :  { %1695 = vmatmul.msk.f32.gmra.mxu3 %vm125_vm0, %v861_v2  ;;  %1147 = vmatpush.msrb.mxu1 %v1126_v1  ;;  %v1125_v2 = vld [vmem:[#allocation7 + $0x520] sm:$0xff]  ;;  %v1291_v36 = vld [vmem:[#allocation7 + $0x608] sm:$0xff] }
 0x22c   :  { %1053 = vmatpush.msra.mxu3 %v1028_v37  ;;  %v1290_v37 = vld [vmem:[#allocation7 + $0x600] sm:$0xff] }
 0x22d   :  { %1148 = vmatpush.msrb.mxu1 %v1125_v2  ;;  %v1244_v1 = vld [vmem:[#allocation5 + $0x180] sm:$0xff]  ;;  %v1182_v2 = vld [vmem:[#allocation5 + $0x168] sm:$0xff] }
 0x22e   :  { %1054 = vmatpush.msra.mxu3 %v1027_v38 }
 0x22f   :  { %1149 = vmatpush.msrb.mxu1 %v1124_v3  ;;  %v1245_v3 = vld [vmem:[#allocation5 + $0x188] sm:$0xff] }
 0x230   :  { %1055 = vmatpush.msra.mxu3 %v1026_v39 }
 0x231   :  { %1150 = vmatpush.msrb.mxu1 %v1123_v4  ;;  %v1183_v4 = vld [vmem:[#allocation5 + $0x170] sm:$0xff] }
 0x232   :  { %1696 = vmatmul.msk.f32.vlgmr.msra.gmra.mxu2 %vm125_vm0, %v979_v8  ;;  %1056 = vmatpush.msra.mxu3 %v1025_v41 }
 0x233   :  { %1151 = vmatpush.msrb.mxu1 %v1122_v5  ;;  %v1246_v5 = vld [vmem:[#allocation5 + $0x190] sm:$0xff] }
 0x235   :  { %1152 = vmatpush.msrb.mxu1 %v1121_v7  ;;  %v1184_v7 = vld [vmem:[#allocation5 + $0x178] sm:$0xff] }
 0x23a   :  { %1697 = vmatmul.msk.f32.gmra.mxu2 %vm125_vm0, %v980_v13 }
 0x242   :  { %1698 = vmatmul.msk.f32.gmra.mxu2 %vm125_vm0, %v981_v19  ;;  %v1304_v19 = vld [vmem:[#allocation7 + $0x670] sm:$0xff] }
 0x24a   :  { %1699 = vmatmul.msk.f32.gmra.mxu2 %vm125_vm0, %v982_v23  ;;  %v1301_v23 = vld [vmem:[#allocation7 + $0x658] sm:$0xff] }
 0x295   :  { %v828_v40 = vpop.f32.mrf.mxu2 }
 0x296   :  { %v891_v6 = vpop.f32.mrf.mxu3  ;;  %965 = vmatmul.f32.vlgmr.msra.gmra.mxu1 %v828_v40 }
 0x297   :  { %936 = vmatmul.f32.vlgmr.msrb.gmra.mxu0 %v891_v6 }
 0x298   :  { %1306 = vmatpush.msrb.mxu0 %v1305_v18  ;;  %v1235_v18 = vld [vmem:[#allocation7 + $0x5c0] sm:$0xff] }
 0x29a   :  { %1307 = vmatpush.msrb.mxu0 %v1304_v19  ;;  %v1366_v19 = vld [vmem:[#allocation5 + $0x1a8] sm:$0xff] }
 0x29c   :  { %1308 = vmatpush.msrb.mxu0 %v1303_v20  ;;  %v1234_v20 = vld [vmem:[#allocation7 + $0x5b8] sm:$0xff] }
 0x29d   :  { %v831_v42 = vpop.f32.mrf.mxu2 }
 0x29e   :  { %v894_v54 = vpop.f32.mrf.mxu3  ;;  %968 = vmatmul.f32.gmra.mxu1 %v831_v42  ;;  %1309 = vmatpush.msrb.mxu0 %v1302_v22  ;;  %v1232_v22 = vld [vmem:[#allocation7 + $0x5a8] sm:$0xff] }
 0x29f   :  { %939 = vmatmul.f32.gmra.mxu0 %v894_v54 }
 0x2a0   :  { %1310 = vmatpush.msrb.mxu0 %v1301_v23  ;;  %v1231_v23 = vld [vmem:[#allocation7 + $0x5a0] sm:$0xff] }
 0x2a2   :  { %1311 = vmatpush.msrb.mxu0 %v1300_v24  ;;  %v1367_v24 = vld [vmem:[#allocation5 + $0x1b0] sm:$0xff] }
 0x2a4   :  { %1312 = vmatpush.msrb.mxu0 %v1299_v25  ;;  %v1230_v25 = vld [vmem:[#allocation7 + $0x598] sm:$0xff] }
 0x2a5   :  { %v834_v43 = vpop.f32.mrf.mxu2 }
 0x2a6   :  { %v897_v16 = vpop.f32.mrf.mxu3  ;;  %971 = vmatmul.f32.gmra.mxu1 %v834_v43  ;;  %1313 = vmatpush.msrb.mxu0 %v1298_v26  ;;  %v1229_v26 = vld [vmem:[#allocation7 + $0x590] sm:$0xff] }
 0x2a7   :  { %942 = vmatmul.f32.gmra.mxu0 %v897_v16 }
 0x2a8   :  { %1314 = vmatpush.msrb.mxu0 %v1297_v28  ;;  %v1368_v28 = vld [vmem:[#allocation5 + $0x1b8] sm:$0xff] }
 0x2aa   :  { %1315 = vmatpush.msrb.mxu0 %v1296_v29  ;;  %v1227_v29 = vld [vmem:[#allocation7 + $0x580] sm:$0xff] }
 0x2ac   :  { %1316 = vmatpush.msrb.mxu0 %v1295_v30  ;;  %v1426_v30 = vld [vmem:[#allocation7 + $0x6f8] sm:$0xff] }
 0x2ad   :  { %v837_v44 = vpop.f32.mrf.mxu2 }
 0x2ae   :  { %v900_v46 = vpop.f32.mrf.mxu3  ;;  %974 = vmatmul.f32.gmra.mxu1 %v837_v44  ;;  %1317 = vmatpush.msrb.mxu0 %v1294_v31  ;;  %v1425_v31 = vld [vmem:[#allocation7 + $0x6f0] sm:$0xff] }
 0x2af   :  { %945 = vmatmul.f32.gmra.mxu0 %v900_v46 }
 0x2b0   :  { %1318 = vmatpush.msrb.mxu0 %v1293_v33  ;;  %v1423_v33 = vld [vmem:[#allocation7 + $0x6e0] sm:$0xff] }
 0x2b2   :  { %1319 = vmatpush.msrb.mxu0 %v1292_v35  ;;  %v1421_v35 = vld [vmem:[#allocation7 + $0x6d0] sm:$0xff] }
 0x2b4   :  { %1320 = vmatpush.msrb.mxu0 %v1291_v36  ;;  %v1420_v36 = vld [vmem:[#allocation7 + $0x6c8] sm:$0xff] }
 0x2b5   :  { %v1012_v45 = vpop.f32.mrf.mxu2 }
 0x2b6   :  { %1057 = vmatmul.f32.vlgmr.msra.gmra.mxu3 %v1012_v45  ;;  %1321 = vmatpush.msrb.mxu0 %v1290_v37  ;;  %v1419_v37 = vld [vmem:[#allocation7 + $0x6c0] sm:$0xff] }
 0x2b7   :  { %1700 = vmatmul.msk.f32.vlgmr.msra.gmra.mxu0 %vm125_vm0, %v1075_v47 }
 0x2bd   :  { %v1015_v49 = vpop.f32.mrf.mxu2 }
 0x2be   :  { %1060 = vmatmul.f32.gmra.mxu3 %v1015_v49 }
 0x2bf   :  { %1701 = vmatmul.msk.f32.gmra.mxu0 %vm125_vm0, %v1076_v48 }
 0x2c5   :  { %v1018_v50 = vpop.f32.mrf.mxu2 }
 0x2c6   :  { %1063 = vmatmul.f32.gmra.mxu3 %v1018_v50  ;;  %v1747_v50 = vld [vmem:[#allocation8 + $0x1] ss:$0 sm:$0xff] }
 0x2c7   :  { %1702 = vmatmul.msk.f32.gmra.mxu0 %vm125_vm0, %v1077_v51 }
 0x2cd   :  { %v1021_v53 = vpop.f32.mrf.mxu2 }
 0x2ce   :  { %1066 = vmatmul.f32.gmra.mxu3 %v1021_v53 }
 0x2cf   :  { %1703 = vmatmul.msk.f32.gmra.mxu0 %vm125_vm0, %v1078_v52 }
 0x313   :  { %v966_v17 = vpop.f32.mrf.mxu1 }
 0x314   :  { %v937_v8 = vpop.f32.mrf.mxu0 }
 0x315   :  { %v967_v46 = vadd.f32 %v966_v17, %v937_v8  ;;  %v1247_v8 = vld [vmem:[#allocation5 + $0x198] sm:$0xff]  ;;  %v1236_v17 = vld [vmem:[#allocation7 + $0x5c8] sm:$0xff] }
 0x31b   :  { %v969_v21 = vpop.f32.mrf.mxu1 }
 0x31c   :  { %v940_v9 = vpop.f32.mrf.mxu0 }
 0x31d   :  { %v970_v43 = vadd.f32 %v969_v21, %v940_v9  ;;  %v1242_v9 = vld [vmem:[#allocation7 + $0x5f8] sm:$0xff]  ;;  %v1233_v21 = vld [vmem:[#allocation7 + $0x5b0] sm:$0xff] }
 0x31e   :  { %1335 = vmatpush.msra.mxu1 %v1242_v9  ;;  %v1510_v9 = vld [vmem:[#allocation7 + $0x718] sm:$0xff] }
 0x323   :  { %v972_v27 = vpop.f32.mrf.mxu1 }
 0x324   :  { %v943_v10 = vpop.f32.mrf.mxu0 }
 0x325   :  { %v973_v42 = vadd.f32 %v972_v27, %v943_v10  ;;  %v1241_v10 = vld [vmem:[#allocation7 + $0x5f0] sm:$0xff]  ;;  %v1228_v27 = vld [vmem:[#allocation7 + $0x588] sm:$0xff] }
 0x326   :  { %1336 = vmatpush.msra.mxu1 %v1241_v10  ;;  %v1509_v10 = vld [vmem:[#allocation7 + $0x710] sm:$0xff] }
 0x32b   :  { %v975_v34 = vpop.f32.mrf.mxu1 }
 0x32c   :  { %v946_v11 = vpop.f32.mrf.mxu0 }
 0x32d   :  { %v976_v16 = vadd.f32 %v975_v34, %v946_v11  ;;  %v1240_v11 = vld [vmem:[#allocation7 + $0x5e8] sm:$0xff]  ;;  %v1422_v34 = vld [vmem:[#allocation7 + $0x6d8] sm:$0xff] }
 0x32e   :  { %1337 = vmatpush.msra.mxu1 %v1240_v11  ;;  %v1508_v11 = vld [vmem:[#allocation7 + $0x708] sm:$0xff] }
 0x334   :  { %v1108_v12 = vpop.f32.mrf.mxu0 }
 0x335   :  { %1153 = vmatmul.f32.vlgmr.msrb.gmra.mxu1 %v1108_v12  ;;  %v1239_v12 = vld [vmem:[#allocation7 + $0x5e0] sm:$0xff] }
 0x336   :  { %1338 = vmatpush.msra.mxu1 %v1239_v12  ;;  %v1507_v12 = vld [vmem:[#allocation7 + $0x700] sm:$0xff] }
 0x339   :  { %v1058_v32 = vpop.f32.mrf.mxu3 }
 0x33a   :  { %v1070_v51 = vadd.f32 %v1058_v32, %v967_v46  ;;  %v1424_v32 = vld [vmem:[#allocation7 + $0x6e8] sm:$0xff] }
 0x33c   :  { %v1111_v13 = vpop.f32.mrf.mxu0 }
 0x33d   :  { %1156 = vmatmul.f32.gmra.mxu1 %v1111_v13  ;;  %v1365_v13 = vld [vmem:[#allocation5 + $0x1a0] sm:$0xff] }
 0x341   :  { %v1061_v38 = vpop.f32.mrf.mxu3 }
 0x342   :  { %v1071_v47 = vadd.f32 %v1061_v38, %v970_v43  ;;  %v1418_v38 = vld [vmem:[#allocation7 + $0x6b8] sm:$0xff] }
 0x344   :  { %v1114_v14 = vpop.f32.mrf.mxu0 }
 0x345   :  { %1159 = vmatmul.f32.gmra.mxu1 %v1114_v14  ;;  %v1238_v14 = vld [vmem:[#allocation7 + $0x5d8] sm:$0xff] }
 0x346   :  { %1339 = vmatpush.msra.mxu1 %v1238_v14 }
 0x349   :  { %v1064_v41 = vpop.f32.mrf.mxu3 }
 0x34a   :  { %v1072_v44 = vadd.f32 %v1064_v41, %v973_v42  ;;  %v1415_v41 = vld [vmem:[#allocation7 + $0x6a0] sm:$0xff]  ;;  %v1413_v42 = vld [vmem:[#allocation7 + $0x690] sm:$0xff] }
 0x34c   :  { %v1117_v15 = vpop.f32.mrf.mxu0 }
 0x34d   :  { %1162 = vmatmul.f32.gmra.mxu1 %v1117_v15  ;;  %v1237_v15 = vld [vmem:[#allocation7 + $0x5d0] sm:$0xff] }
 0x34e   :  { %1340 = vmatpush.msra.mxu1 %v1237_v15 }
 0x350   :  { %1341 = vmatpush.msra.mxu1 %v1236_v17 }
 0x351   :  { %v1067_v54 = vpop.f32.mrf.mxu3 }
 0x352   :  { %v1073_v45 = vadd.f32 %v1067_v54, %v976_v16  ;;  %1342 = vmatpush.msra.mxu1 %v1235_v18  ;;  %v1412_v54 = vld [vmem:[#allocation7 + $0x688] sm:$0xff]  ;;  %v1411_v16 = vld [vmem:[#allocation7 + $0x680] sm:$0xff] }
 0x353   :  { %v1581_v18 = vld [vmem:[#allocation10 + $0x78] sm:$0xff] }
 0x354   :  { %1343 = vmatpush.msra.mxu1 %v1234_v20 }
 0x356   :  { %1344 = vmatpush.msra.mxu1 %v1233_v21  ;;  %v1579_v21 = vld [vmem:[#allocation10 + $0x68] sm:$0xff] }
 0x358   :  { %1345 = vmatpush.msra.mxu1 %v1232_v22  ;;  %v1578_v22 = vld [vmem:[#allocation10 + $0x60] sm:$0xff] }
 0x35a   :  { %1346 = vmatpush.msra.mxu1 %v1231_v23  ;;  %v1577_v23 = vld [vmem:[#allocation10 + $0x58] sm:$0xff] }
 0x35c   :  { %1347 = vmatpush.msra.mxu1 %v1230_v25 }
 0x35e   :  { %1348 = vmatpush.msra.mxu1 %v1229_v26  ;;  %v1575_v26 = vld [vmem:[#allocation10 + $0x48] sm:$0xff] }
 0x360   :  { %1349 = vmatpush.msra.mxu1 %v1228_v27  ;;  %v1574_v27 = vld [vmem:[#allocation10 + $0x40] sm:$0xff] }
 0x362   :  { %1350 = vmatpush.msra.mxu1 %v1227_v29  ;;  %v1572_v29 = vld [vmem:[#allocation10 + $0x30] sm:$0xff] }
 0x3b2   :  { %v1154_v39 = vpop.f32.mrf.mxu1 }
 0x3b3   :  { %v1166_v55 = vadd.f32 %v1154_v39, %v1070_v51  ;;  %v1417_v39 = vld [vmem:[#allocation7 + $0x6b0] sm:$0xff] }
 0x3b5   :  { %v1172_v60 = vadd.f32 %v1747_v50, %v1166_v55 }
 0x3b7   :  { %v1176_v63 = vmax.f32 %v1172_v60, 0.0  ;;  %v1522_v60 = vld [vmem:[#allocation7 + $0x778] sm:$0xff] }
 0x3b8   :  { %1523 = vmatpush.msrb.mxu1 %v1522_v60 }
 0x3ba   :  { %v1157_v40 = vpop.f32.mrf.mxu1 }
 0x3bb   :  { %v1167_v52 = vadd.f32 %v1157_v40, %v1071_v47  ;;  %v1416_v40 = vld [vmem:[#allocation7 + $0x6a8] sm:$0xff] }
 0x3bd   :  { %v1173_v58 = vadd.f32 %v1747_v50, %v1167_v52 }
 0x3bf   :  { %v1177_v62 = vmax.f32 %v1173_v58, 0.0  ;;  %v1464_v58 = vld [vmem:[#allocation5 + $0x1d8] sm:$0xff] }
 0x3c2   :  { %v1160_v6 = vpop.f32.mrf.mxu1 }
 0x3c3   :  { %v1168_v48 = vadd.f32 %v1160_v6, %v1072_v44  ;;  %v1414_v6 = vld [vmem:[#allocation7 + $0x698] sm:$0xff] }
 0x3c5   :  { %v1174_v56 = vadd.f32 %v1747_v50, %v1168_v48 }
 0x3c7   :  { %v1178_v61 = vmax.f32 %v1174_v56, 0.0  ;;  %v1463_v56 = vld [vmem:[#allocation5 + $0x1d0] sm:$0xff] }
 0x3ca   :  { %v1163_v49 = vpop.f32.mrf.mxu1 }
 0x3cb   :  { %v1169_v53 = vadd.f32 %v1163_v49, %v1073_v45 }
 0x3cd   :  { %v1175_v57 = vadd.f32 %v1747_v50, %v1169_v53  ;;  %v1461_v50 = vld [vmem:[#allocation5 + $0x1c0] sm:$0xff]  ;;  %v1462_v53 = vld [vmem:[#allocation5 + $0x1c8] sm:$0xff] }
 0x3cf   :  { %v1179_v59 = vmax.f32 %v1175_v57, 0.0 }
 0x3d1   :  { %1209 = vmatpush.msrb.mxu2 %v1179_v59  ;;  %1272 = vmatpush.msrb.mxu3 %v1179_v59 }
 0x3d2   :  { %1489 = vmatpush.msra.mxu0 %v1179_v59 }
 0x3d3   :  { %1210 = vmatpush.msrb.mxu2 %v1178_v61  ;;  %1273 = vmatpush.msrb.mxu3 %v1178_v61 }
 0x3d4   :  { %1490 = vmatpush.msra.mxu0 %v1178_v61 }
 0x3d5   :  { %1211 = vmatpush.msrb.mxu2 %v1177_v62  ;;  %1274 = vmatpush.msrb.mxu3 %v1177_v62 }
 0x3d6   :  { %1491 = vmatpush.msra.mxu0 %v1177_v62 }
 0x3d7   :  { %1212 = vmatpush.msrb.mxu2 %v1176_v63  ;;  %1275 = vmatpush.msrb.mxu3 %v1176_v63 }
 0x3d8   :  { %1492 = vmatpush.msra.mxu0 %v1176_v63  ;;  %1704 = vmatmul.msk.f32.vlgmr.msrb.gmra.mxu2 %vm125_vm0, %v1181_v0  ;;  %v1518_v0 = vld [vmem:[#allocation7 + $0x758] sm:$0xff] }
 0x3d9   :  { %1708 = vmatmul.msk.f32.vlgmr.msrb.gmra.mxu3 %vm125_vm0, %v1244_v1  ;;  %1393 = vmatpush.msra.mxu2 %v1179_v59  ;;  %v1517_v1 = vld [vmem:[#allocation7 + $0x750] sm:$0xff] }
 0x3da   :  { %1427 = vmatpush.msra.mxu3 %v1426_v30 }
 0x3db   :  { %1394 = vmatpush.msra.mxu2 %v1178_v61  ;;  %v1521_v61 = vld [vmem:[#allocation7 + $0x770] sm:$0xff] }
 0x3dc   :  { %1428 = vmatpush.msra.mxu3 %v1425_v31  ;;  %1524 = vmatpush.msrb.mxu1 %v1521_v61  ;;  %v1571_v31 = vld [vmem:[#allocation10 + $0x28] sm:$0xff] }
 0x3dd   :  { %1395 = vmatpush.msra.mxu2 %v1177_v62  ;;  %v1520_v62 = vld [vmem:[#allocation7 + $0x768] sm:$0xff] }
 0x3de   :  { %1429 = vmatpush.msra.mxu3 %v1424_v32  ;;  %1525 = vmatpush.msrb.mxu1 %v1520_v62  ;;  %v1570_v32 = vld [vmem:[#allocation10 + $0x20] sm:$0xff] }
 0x3df   :  { %1396 = vmatpush.msra.mxu2 %v1176_v63  ;;  %v1519_v63 = vld [vmem:[#allocation7 + $0x760] sm:$0xff] }
 0x3e0   :  { %1705 = vmatmul.msk.f32.gmra.mxu2 %vm125_vm0, %v1182_v2  ;;  %1430 = vmatpush.msra.mxu3 %v1423_v33  ;;  %v1516_v2 = vld [vmem:[#allocation7 + $0x748] sm:$0xff] }
 0x3e1   :  { %1709 = vmatmul.msk.f32.gmra.mxu3 %vm125_vm0, %v1245_v3  ;;  %1526 = vmatpush.msrb.mxu1 %v1519_v63  ;;  %v1515_v3 = vld [vmem:[#allocation7 + $0x740] sm:$0xff] }
 0x3e2   :  { %1431 = vmatpush.msra.mxu3 %v1422_v34  ;;  %1582 = vmatpush.msrb.mxu2 %v1581_v18 }
 0x3e3   :  { %1527 = vmatpush.msrb.mxu1 %v1518_v0 }
 0x3e4   :  { %1432 = vmatpush.msra.mxu3 %v1421_v35  ;;  %v1569_v35 = vld [vmem:[#allocation10 + $0x18] sm:$0xff] }
 0x3e5   :  { %1528 = vmatpush.msrb.mxu1 %v1517_v1 }
 0x3e6   :  { %1433 = vmatpush.msra.mxu3 %v1420_v36  ;;  %v1568_v36 = vld [vmem:[#allocation10 + $0x10] sm:$0xff] }
 0x3e7   :  { %1529 = vmatpush.msrb.mxu1 %v1516_v2 }
 0x3e8   :  { %1706 = vmatmul.msk.f32.gmra.mxu2 %vm125_vm0, %v1183_v4  ;;  %1434 = vmatpush.msra.mxu3 %v1419_v37  ;;  %v1514_v4 = vld [vmem:[#allocation7 + $0x738] sm:$0xff]  ;;  %v1567_v37 = vld [vmem:[#allocation10 + $0x8] sm:$0xff] }
 0x3e9   :  { %1710 = vmatmul.msk.f32.gmra.mxu3 %vm125_vm0, %v1246_v5  ;;  %1530 = vmatpush.msrb.mxu1 %v1515_v3  ;;  %v1513_v5 = vld [vmem:[#allocation7 + $0x730] sm:$0xff] }
 0x3ea   :  { %1435 = vmatpush.msra.mxu3 %v1418_v38 }
 0x3eb   :  { %1531 = vmatpush.msrb.mxu1 %v1514_v4 }
 0x3ec   :  { %1436 = vmatpush.msra.mxu3 %v1417_v39  ;;  %v1566_v39 = vld [vmem:[#allocation10] sm:$0xff] }
 0x3ed   :  { %1532 = vmatpush.msrb.mxu1 %v1513_v5 }
 0x3ee   :  { %1437 = vmatpush.msra.mxu3 %v1416_v40 }
 0x3f0   :  { %1707 = vmatmul.msk.f32.gmra.mxu2 %vm125_vm0, %v1184_v7  ;;  %1438 = vmatpush.msra.mxu3 %v1415_v41  ;;  %v1512_v7 = vld [vmem:[#allocation7 + $0x728] sm:$0xff] }
 0x3f1   :  { %1711 = vmatmul.msk.f32.gmra.mxu3 %vm125_vm0, %v1247_v8  ;;  %1533 = vmatpush.msrb.mxu1 %v1512_v7  ;;  %v1511_v8 = vld [vmem:[#allocation7 + $0x720] sm:$0xff] }
 0x3f2   :  { %1439 = vmatpush.msra.mxu3 %v1414_v6 }
 0x3f3   :  { %1534 = vmatpush.msrb.mxu1 %v1511_v8 }
 0x3f4   :  { %1440 = vmatpush.msra.mxu3 %v1413_v42 }
 0x3f5   :  { %1535 = vmatpush.msrb.mxu1 %v1510_v9 }
 0x3f6   :  { %1441 = vmatpush.msra.mxu3 %v1412_v54 }
 0x3f7   :  { %1536 = vmatpush.msrb.mxu1 %v1509_v10  ;;  %v1611_v10 = vld [vmem:[#allocation11] sm:$0xff] }
 0x3f8   :  { %1712 = vmatmul.msk.f32.vlgmr.msra.gmra.mxu2 %vm125_vm0, %v1365_v13  ;;  %1442 = vmatpush.msra.mxu3 %v1411_v16 }
 0x3f9   :  { %1537 = vmatpush.msrb.mxu1 %v1508_v11  ;;  %v1749_v11 = vld [vmem:[%s2130_s5] ss:$0 sm:$0xff] }
 0x3fb   :  { %1538 = vmatpush.msrb.mxu1 %v1507_v12 }
 0x400   :  { %1713 = vmatmul.msk.f32.gmra.mxu2 %vm125_vm0, %v1366_v19  ;;  %v1580_v19 = vld [vmem:[#allocation10 + $0x70] sm:$0xff] }
 0x401   :  { %1583 = vmatpush.msrb.mxu2 %v1580_v19 }
 0x403   :  { %1584 = vmatpush.msrb.mxu2 %v1579_v21 }
 0x405   :  { %1585 = vmatpush.msrb.mxu2 %v1578_v22 }
 0x407   :  { %1586 = vmatpush.msrb.mxu2 %v1577_v23 }
 0x408   :  { %1714 = vmatmul.msk.f32.gmra.mxu2 %vm125_vm0, %v1367_v24  ;;  %v1576_v24 = vld [vmem:[#allocation10 + $0x50] sm:$0xff] }
 0x409   :  { %1587 = vmatpush.msrb.mxu2 %v1576_v24 }
 0x40b   :  { %1588 = vmatpush.msrb.mxu2 %v1575_v26 }
 0x40d   :  { %1589 = vmatpush.msrb.mxu2 %v1574_v27 }
 0x410   :  { %1715 = vmatmul.msk.f32.gmra.mxu2 %vm125_vm0, %v1368_v28  ;;  %v1573_v28 = vld [vmem:[#allocation10 + $0x38] sm:$0xff] }
 0x411   :  { %1590 = vmatpush.msrb.mxu2 %v1573_v28 }
 0x413   :  { %1591 = vmatpush.msrb.mxu2 %v1572_v29 }
 0x415   :  { %1592 = vmatpush.msrb.mxu2 %v1571_v31 }
 0x417   :  { %1593 = vmatpush.msrb.mxu2 %v1570_v32 }
 0x419   :  { %1594 = vmatpush.msrb.mxu2 %v1569_v35 }
 0x41b   :  { %1595 = vmatpush.msrb.mxu2 %v1568_v36 }
 0x41d   :  { %1596 = vmatpush.msrb.mxu2 %v1567_v37 }
 0x41f   :  { %1597 = vmatpush.msrb.mxu2 %v1566_v39 }
 0x45b   :  { %v1214_v43 = vpop.f32.mrf.mxu2 }
 0x45c   :  { %v1277_v44 = vpop.f32.mrf.mxu3  ;;  %1351 = vmatmul.f32.vlgmr.msra.gmra.mxu1 %v1214_v43  ;;  %v1748_v43 = vld [vmem:[#allocation8 + $0x2] ss:$0 sm:$0xff] }
 0x45d   :  { %1322 = vmatmul.f32.vlgmr.msrb.gmra.mxu0 %v1277_v44 }
 0x463   :  { %v1217_v46 = vpop.f32.mrf.mxu2 }
 0x464   :  { %v1280_v47 = vpop.f32.mrf.mxu3  ;;  %1354 = vmatmul.f32.gmra.mxu1 %v1217_v46 }
 0x465   :  { %1325 = vmatmul.f32.gmra.mxu0 %v1280_v47 }
 0x46b   :  { %v1220_v45 = vpop.f32.mrf.mxu2 }
 0x46c   :  { %v1283_v48 = vpop.f32.mrf.mxu3  ;;  %1357 = vmatmul.f32.gmra.mxu1 %v1220_v45 }
 0x46d   :  { %1328 = vmatmul.f32.gmra.mxu0 %v1283_v48 }
 0x473   :  { %v1223_v49 = vpop.f32.mrf.mxu2 }
 0x474   :  { %v1286_v51 = vpop.f32.mrf.mxu3  ;;  %1360 = vmatmul.f32.gmra.mxu1 %v1223_v49 }
 0x475   :  { %1331 = vmatmul.f32.gmra.mxu0 %v1286_v51 }
 0x47b   :  { %v1398_v52 = vpop.f32.mrf.mxu2 }
 0x47c   :  { %1443 = vmatmul.f32.vlgmr.msra.gmra.mxu3 %v1398_v52 }
 0x47d   :  { %1716 = vmatmul.msk.f32.vlgmr.msra.gmra.mxu0 %vm125_vm0, %v1461_v50 }
 0x483   :  { %v1401_v55 = vpop.f32.mrf.mxu2 }
 0x484   :  { %1446 = vmatmul.f32.gmra.mxu3 %v1401_v55 }
 0x485   :  { %1717 = vmatmul.msk.f32.gmra.mxu0 %vm125_vm0, %v1462_v53 }
 0x48b   :  { %v1404_v57 = vpop.f32.mrf.mxu2 }
 0x48c   :  { %1449 = vmatmul.f32.gmra.mxu3 %v1404_v57 }
 0x48d   :  { %1718 = vmatmul.msk.f32.gmra.mxu0 %vm125_vm0, %v1463_v56 }
 0x493   :  { %v1407_v59 = vpop.f32.mrf.mxu2 }
 0x494   :  { %1452 = vmatmul.f32.gmra.mxu3 %v1407_v59 }
 0x495   :  { %1719 = vmatmul.msk.f32.gmra.mxu0 %vm125_vm0, %v1464_v58 }
 0x4d9   :  { %v1352_v34 = vpop.f32.mrf.mxu1 }
 0x4da   :  { %v1323_v13 = vpop.f32.mrf.mxu0 }
 0x4db   :  { %v1353_v42 = vadd.f32 %v1352_v34, %v1323_v13 }
 0x4e1   :  { %v1355_v38 = vpop.f32.mrf.mxu1 }
 0x4e2   :  { %v1326_v14 = vpop.f32.mrf.mxu0 }
 0x4e3   :  { %v1356_v45 = vadd.f32 %v1355_v38, %v1326_v14 }
 0x4e9   :  { %v1358_v40 = vpop.f32.mrf.mxu1 }
 0x4ea   :  { %v1329_v15 = vpop.f32.mrf.mxu0 }
 0x4eb   :  { %v1359_v55 = vadd.f32 %v1358_v40, %v1329_v15 }
 0x4f1   :  { %v1361_v6 = vpop.f32.mrf.mxu1 }
 0x4f2   :  { %v2115_v17 = vpop.f32.mrf.mxu0 }
 0x4f3   :  { %v1362_v62 = vadd.f32 %v1361_v6, %v2115_v17 }
 0x4fa   :  { %v1494_v20 = vpop.f32.mrf.mxu0 }
 0x4fb   :  { %1539 = vmatmul.f32.vlgmr.msrb.gmra.mxu1 %v1494_v20 }
 0x4ff   :  { %v1444_v41 = vpop.f32.mrf.mxu3 }
 0x500   :  { %v1456_v54 = vadd.f32 %v1444_v41, %v1353_v42 }
 0x502   :  { %v1497_v25 = vpop.f32.mrf.mxu0 }
 0x503   :  { %1542 = vmatmul.f32.gmra.mxu1 %v1497_v25 }
 0x507   :  { %v1447_v16 = vpop.f32.mrf.mxu3 }
 0x508   :  { %v1457_v49 = vadd.f32 %v1447_v16, %v1356_v45 }
 0x50a   :  { %v1500_v30 = vpop.f32.mrf.mxu0 }
 0x50b   :  { %1545 = vmatmul.f32.gmra.mxu1 %v1500_v30 }
 0x50f   :  { %v1450_v52 = vpop.f32.mrf.mxu3 }
 0x510   :  { %v1458_v57 = vadd.f32 %v1450_v52, %v1359_v55 }
 0x512   :  { %v1503_v33 = vpop.f32.mrf.mxu0 }
 0x513   :  { %1548 = vmatmul.f32.gmra.mxu1 %v1503_v33 }
 0x517   :  { %v1453_v61 = vpop.f32.mrf.mxu3 }
 0x518   :  { %v1459_v0 = vadd.f32 %v1453_v61, %v1362_v62 }
 0x578   :  { %v1540_v44 = vpop.f32.mrf.mxu1 }
 0x579   :  { %v1552_v46 = vadd.f32 %v1540_v44, %v1456_v54 }
 0x57b   :  { %v1558_v47 = vadd.f32 %v1748_v43, %v1552_v46 }
 0x57d   :  { %v1562_v48 = vmax.f32 %v1558_v47, 0.0 }
 0x57f   :  { %1598 = vmatmul.f32.vlgmr.msrb.gmra.mxu2 %v1562_v48 }
 0x580   :  { %v1543_v51 = vpop.f32.mrf.mxu1 }
 0x581   :  { %v1553_v50 = vadd.f32 %v1543_v51, %v1457_v49 }
 0x583   :  { %v1559_v53 = vadd.f32 %v1748_v43, %v1553_v50 }
 0x585   :  { %v1563_v56 = vmax.f32 %v1559_v53, 0.0 }
 0x587   :  { %1601 = vmatmul.f32.gmra.mxu2 %v1563_v56 }
 0x588   :  { %v1546_v58 = vpop.f32.mrf.mxu1 }
 0x589   :  { %v1554_v59 = vadd.f32 %v1546_v58, %v1458_v57 }
 0x58b   :  { %v1560_v60 = vadd.f32 %v1748_v43, %v1554_v59 }
 0x58d   :  { %v1564_v63 = vmax.f32 %v1560_v60, 0.0 }
 0x58f   :  { %1604 = vmatmul.f32.gmra.mxu2 %v1564_v63 }
 0x590   :  { %v1549_v1 = vpop.f32.mrf.mxu1 }
 0x591   :  { %v1555_v2 = vadd.f32 %v1549_v1, %v1459_v0 }
 0x593   :  { %v1561_v3 = vadd.f32 %v1748_v43, %v1555_v2 }
 0x595   :  { %v1565_v4 = vmax.f32 %v1561_v3, 0.0 }
 0x597   :  { %1607 = vmatmul.f32.gmra.mxu2 %v1565_v4 }
 0x602   :  { %v1599_v5 = vpop.f32.mrf.mxu2 }
 0x60a   :  { %v1602_v7 = vpop.f32.mrf.mxu2 }
 0x612   :  { %v1605_v8 = vpop.f32.mrf.mxu2 }
 0x61a   :  { %v1608_v9 = vpop.f32.mrf.mxu2 }
 0x61b   :  { %1631 = vmatpush.msrb.mxu3 %v1608_v9 }
 0x61d   :  { %1632 = vmatpush.msrb.mxu3 %v1605_v8 }
 0x61f   :  { %1633 = vmatpush.msrb.mxu3 %v1602_v7 }
 0x621   :  { %1634 = vmatpush.msrb.mxu3 %v1599_v5 }
 0x622   :  { %1720 = vmatmul.msk.f32.vlgmr.msrb.gmra.mxu3 %vm125_vm0, %v1611_v10 }
 0x6a5   :  { %v1636_v12 = vpop.f32.mrf.mxu3 }
 0x6a6   :  { %v1637_v13 = vadd.f32 %v1749_v11, %v1636_v12 }
 0x6a8   :  { %1639 = vst [vmem:[#allocation13] sm:$0xff] %v1637_v13 }
 0x6a9   :  { %1650 = dma.vmem_to_hbm [thread:$0]  %s1646_s30, 128, %s1648_s10, [#allocation4]  }
 0x6aa   :  { %1926 = dma.done.wait [#allocation4], 128  }
 0x6ab   :  { %1927 = vsyncadd [#allocation4], 4294967168 }
 0x6ac   :  { %1655 = vsyncpa [#allocation3], 1 }
 0x6ad   :  { %1656 = vsyncpa [#allocation6], 1 }
 0x6ae   :  { %1657 = vsyncpa [#allocation9], 1 }
 0x6af   :  { %1658 = vsyncpa [#allocation12], 1 }
 0x6b0   :  { %1659 = vsyncpa [#allocation4], 1 }

</bundles_post_ra>
